<compile_context>
chip_gen: v7x
topology: tpu7x:2x2x1
jax: 0.10.0
libtpu: 0.0.40
codegen_flags: <defaults>
</compile_context>

<pallas_src>
import jax
import jax.numpy as jnp
from jax.experimental import pallas as pl
from jax.experimental.pallas import tpu as pltpu

TB = 512  # batch tile (lanes); multiple of 256 keeps the v6e/v7x MXU full,
          # and a (64, 512) f32 activation is 32 of 64 vregs (no spill).


def net_kernel(x_ref, w1_ref, b1_ref, w2_ref, b2_ref, w3_ref, b3_ref, o_ref):
    tb = x_ref.shape[-1]

    # Weights/biases: read once per grid step (they are VMEM-resident, the
    # index_map pins them to block (0, 0) so they are not re-DMA'd).
    w1 = w1_ref[...]                                   # (64, 8)  bf16
    w2 = w2_ref[...]                                   # (64, 64) bf16
    w3 = w3_ref[...]                                   # (2, 64)  bf16
    b1 = b1_ref[...]                                   # (64, 1)  f32
    b3 = b3_ref[...]                                   # (2, 1)   f32
    # Hoist the bias broadcast out of the 9-iteration loop (JAX does not CSE
    # broadcast_in_dim).
    b2 = jnp.broadcast_to(b2_ref[...], (64, tb))       # (64, TB) f32

    # fc1 + relu:  h = relu(W1 @ x + b1),  x is (8, TB) bf16, batch on lanes.
    x = x_ref[...]
    h = jnp.dot(w1, x, preferred_element_type=jnp.float32)      # (64, TB) f32
    h = jnp.maximum(h + b1, 0.0)

    # 9 applications of the (shared) 64->64 layer + relu (static unroll).
    for _ in range(9):
        h = jnp.dot(w2, h.astype(jnp.bfloat16),
                    preferred_element_type=jnp.float32)
        h = jnp.maximum(h + b2, 0.0)

    # fc12
    logits = jnp.dot(w3, h.astype(jnp.bfloat16),
                     preferred_element_type=jnp.float32) + b3    # (2, TB) f32

    # exp(log_softmax(., dim=classes)) == softmax over the 2-class sublane dim.
    m = jnp.max(logits, axis=0, keepdims=True)
    e = jnp.exp(logits - m)
    s = jnp.sum(e, axis=0, keepdims=True)
    o_ref[...] = e * pl.reciprocal(s, approx=True)     # EUP slot, off the VPU


def net_forward(x, params):
    """x: any shape whose element count is divisible by 8 (PyTorch X.view(-1, 8))."""
    w1, b1, w2, b2, w3, b3 = params   # weights stored PyTorch-style (out, in); biases (out, 1)
    x2 = x.reshape(-1, 8).astype(jnp.float32)
    n = x2.shape[0]
    n_pad = pl.cdiv(n, TB) * TB

    # Batch-on-lanes: (8, N_pad) bf16 input slab (halves x DMA bytes too).
    xt = jnp.pad(x2.T, ((0, 0), (0, n_pad - n))).astype(jnp.bfloat16)

    out_t = pl.pallas_call(
        net_kernel,
        out_shape=jax.ShapeDtypeStruct((2, n_pad), jnp.float32),
        grid_spec=pltpu.PrefetchScalarGridSpec(
            num_scalar_prefetch=0,
            grid=(n_pad // TB,),
            in_specs=[
                pl.BlockSpec((8, TB), lambda i: (0, i)),     # x tile
                pl.BlockSpec((64, 8), lambda i: (0, 0)),     # w1
                pl.BlockSpec((64, 1), lambda i: (0, 0)),     # b1
                pl.BlockSpec((64, 64), lambda i: (0, 0)),    # w2 (shared hidden)
                pl.BlockSpec((64, 1), lambda i: (0, 0)),     # b2
                pl.BlockSpec((2, 64), lambda i: (0, 0)),     # w3
                pl.BlockSpec((2, 1), lambda i: (0, 0)),      # b3
            ],
            out_specs=pl.BlockSpec((2, TB), lambda i: (0, i)),
        ),
        compiler_params=pltpu.CompilerParams(
            dimension_semantics=("parallel",)),
    )(
        xt,
        w1.astype(jnp.bfloat16), b1,
        w2.astype(jnp.bfloat16), b2,
        w3.astype(jnp.bfloat16), b3,
    )
    # back to the PyTorch (N, 2) layout, dropping the batch padding
    return out_t[:, :n].T


def init_params(key):
    """Deterministic init mimicking PyTorch Linear default: U(-1/sqrt(fan_in), .)."""
    ks = jax.random.split(key, 6)

    def lin(kw, kb, fan_in, fan_out):
        bound = 1.0 / jnp.sqrt(fan_in)
        w = jax.random.uniform(kw, (fan_out, fan_in), jnp.float32, -bound, bound)
        b = jax.random.uniform(kb, (fan_out, 1), jnp.float32, -bound, bound)
        return w, b

    w1, b1 = lin(ks[0], ks[1], 8, 64)    # fc1
    w2, b2 = lin(ks[2], ks[3], 64, 64)   # the single shared hidden layer
    w3, b3 = lin(ks[4], ks[5], 64, 2)    # fc12
    return (w1, b1, w2, b2, w3, b3)


def _reference_bf16(x, params):
    """Pure-JAX reference with the same bf16-input / f32-accumulate numerics."""
    w1, b1, w2, b2, w3, b3 = params
    x2 = x.reshape(-1, 8).astype(jnp.float32).astype(jnp.bfloat16)
    h = jnp.dot(x2, w1.astype(jnp.bfloat16).T,
                preferred_element_type=jnp.float32) + b1.T
    h = jnp.maximum(h, 0.0)
    for _ in range(9):
        h = jnp.dot(h.astype(jnp.bfloat16), w2.astype(jnp.bfloat16).T,
                    preferred_element_type=jnp.float32) + b2.T
        h = jnp.maximum(h, 0.0)
    logits = jnp.dot(h.astype(jnp.bfloat16), w3.astype(jnp.bfloat16).T,
                     preferred_element_type=jnp.float32) + b3.T
    return jax.nn.softmax(logits, axis=1)


def _reference_f32(x, params):
    w1, b1, w2, b2, w3, b3 = params
    h = jnp.maximum(x.reshape(-1, 8).astype(jnp.float32) @ w1.T + b1.T, 0.0)
    for _ in range(9):
        h = jnp.maximum(h @ w2.T + b2.T, 0.0)
    logits = h @ w3.T + b3.T
    return jax.nn.softmax(logits, axis=1)


if __name__ == "__main__":
    key = jax.random.PRNGKey(0)
    k_x, k_p = jax.random.split(key)

    # small batch consistent with X.view(-1, 8): 8 rows of 8 features
    x = jax.random.normal(k_x, (8, 8), dtype=jnp.float32)
    params = init_params(k_p)

    out = net_forward(x, params)
    out = jax.block_until_ready(out)

    assert out.shape == (8, 2)
    # probabilities sum to 1 (up to approx-reciprocal error)
    assert jnp.allclose(jnp.sum(out, axis=1), 1.0, atol=2e-3)
    # matched-numerics reference (bf16 matmul inputs, f32 accumulation)
    ref_bf16 = _reference_bf16(x, params)
    assert jnp.allclose(out, ref_bf16, atol=5e-3, rtol=5e-3)
    # loose sanity check against the full-f32 reference
    ref_f32 = _reference_f32(x, params)
    assert jnp.allclose(out, ref_f32, atol=5e-2)

    print("KERNEL_OK")
</pallas_src>

<mosaic_0001>
module attributes {stable_mosaic.version = 11 : i64} {
  func.func @net_kernel(%arg0: i32, %arg1: memref<8x512xbf16, #tpu.memory_space<vmem>>, %arg2: memref<64x8xbf16, #tpu.memory_space<vmem>>, %arg3: memref<64x1xf32, #tpu.memory_space<vmem>>, %arg4: memref<64x64xbf16, #tpu.memory_space<vmem>>, %arg5: memref<64x1xf32, #tpu.memory_space<vmem>>, %arg6: memref<2x64xbf16, #tpu.memory_space<vmem>>, %arg7: memref<2x1xf32, #tpu.memory_space<vmem>>, %arg8: memref<2x512xf32, #tpu.memory_space<vmem>>) attributes {dimension_semantics = [#tpu.dimension_semantics<parallel>], iteration_bounds = array<i64: 1>, scalar_prefetch = 0 : i64, scratch_operands = 0 : i64, tpu.core_type = #tpu.core_type<tc>, window_params = [{transform_indices = @transform_0, window_bounds = array<i64: 8, 512>}, {pipeline_mode = #tpu.pipeline_mode<synchronous>, transform_indices = @transform_1, window_bounds = array<i64: 64, 8>}, {pipeline_mode = #tpu.pipeline_mode<synchronous>, transform_indices = @transform_2, window_bounds = array<i64: 64, 1>}, {pipeline_mode = #tpu.pipeline_mode<synchronous>, transform_indices = @transform_3, window_bounds = array<i64: 64, 64>}, {pipeline_mode = #tpu.pipeline_mode<synchronous>, transform_indices = @transform_4, window_bounds = array<i64: 64, 1>}, {pipeline_mode = #tpu.pipeline_mode<synchronous>, transform_indices = @transform_5, window_bounds = array<i64: 2, 64>}, {pipeline_mode = #tpu.pipeline_mode<synchronous>, transform_indices = @transform_6, window_bounds = array<i64: 2, 1>}, {transform_indices = @transform_7, window_bounds = array<i64: 2, 512>}]} {
    %c0 = arith.constant 0 : index
    %c0_0 = arith.constant 0 : index
    %0 = vector.load %arg2[%c0, %c0_0] : memref<64x8xbf16, #tpu.memory_space<vmem>>, vector<64x8xbf16>
    %c0_1 = arith.constant 0 : index
    %c0_2 = arith.constant 0 : index
    %1 = vector.load %arg4[%c0_1, %c0_2] : memref<64x64xbf16, #tpu.memory_space<vmem>>, vector<64x64xbf16>
    %c0_3 = arith.constant 0 : index
    %c0_4 = arith.constant 0 : index
    %2 = vector.load %arg6[%c0_3, %c0_4] : memref<2x64xbf16, #tpu.memory_space<vmem>>, vector<2x64xbf16>
    %c0_5 = arith.constant 0 : index
    %c0_6 = arith.constant 0 : index
    %3 = vector.load %arg3[%c0_5, %c0_6] : memref<64x1xf32, #tpu.memory_space<vmem>>, vector<64x1xf32>
    %c0_7 = arith.constant 0 : index
    %c0_8 = arith.constant 0 : index
    %4 = vector.load %arg7[%c0_7, %c0_8] : memref<2x1xf32, #tpu.memory_space<vmem>>, vector<2x1xf32>
    %c0_9 = arith.constant 0 : index
    %c0_10 = arith.constant 0 : index
    %5 = vector.load %arg5[%c0_9, %c0_10] : memref<64x1xf32, #tpu.memory_space<vmem>>, vector<64x1xf32>
    %6 = vector.shape_cast %5 : vector<64x1xf32> to vector<64x1xf32>
    %7 = vector.broadcast %6 : vector<64x1xf32> to vector<64x512xf32>
    %c0_11 = arith.constant 0 : index
    %c0_12 = arith.constant 0 : index
    %8 = vector.load %arg1[%c0_11, %c0_12] : memref<8x512xbf16, #tpu.memory_space<vmem>>, vector<8x512xbf16>
    %cst = arith.constant dense<0.000000e+00> : vector<64x512xf32>
    %9 = tpu.matmul %0, %8, %cst {dimension_numbers = #tpu.dot_dimension_numbers<[1], [0], [0], [1], [0, 0, 1, 1], [], []>} : vector<64x8xbf16>, vector<8x512xbf16>, vector<64x512xf32> -> vector<64x512xf32>
    %10 = vector.broadcast %3 : vector<64x1xf32> to vector<64x512xf32>
    %11 = arith.addf %9, %10 : vector<64x512xf32>
    %cst_13 = arith.constant 0.000000e+00 : f32
    %12 = vector.broadcast %cst_13 : f32 to vector<64x512xf32>
    %13 = arith.maximumf %11, %12 : vector<64x512xf32>
    %14 = arith.truncf %13 : vector<64x512xf32> to vector<64x512xbf16>
    %cst_14 = arith.constant dense<0.000000e+00> : vector<64x512xf32>
    %15 = tpu.matmul %1, %14, %cst_14 {dimension_numbers = #tpu.dot_dimension_numbers<[1], [0], [0], [1], [0, 0, 1, 1], [], []>} : vector<64x64xbf16>, vector<64x512xbf16>, vector<64x512xf32> -> vector<64x512xf32>
    %16 = arith.addf %15, %7 : vector<64x512xf32>
    %cst_15 = arith.constant 0.000000e+00 : f32
    %17 = vector.broadcast %cst_15 : f32 to vector<64x512xf32>
    %18 = arith.maximumf %16, %17 : vector<64x512xf32>
    %19 = arith.truncf %18 : vector<64x512xf32> to vector<64x512xbf16>
    %cst_16 = arith.constant dense<0.000000e+00> : vector<64x512xf32>
    %20 = tpu.matmul %1, %19, %cst_16 {dimension_numbers = #tpu.dot_dimension_numbers<[1], [0], [0], [1], [0, 0, 1, 1], [], []>} : vector<64x64xbf16>, vector<64x512xbf16>, vector<64x512xf32> -> vector<64x512xf32>
    %21 = arith.addf %20, %7 : vector<64x512xf32>
    %cst_17 = arith.constant 0.000000e+00 : f32
    %22 = vector.broadcast %cst_17 : f32 to vector<64x512xf32>
    %23 = arith.maximumf %21, %22 : vector<64x512xf32>
    %24 = arith.truncf %23 : vector<64x512xf32> to vector<64x512xbf16>
    %cst_18 = arith.constant dense<0.000000e+00> : vector<64x512xf32>
    %25 = tpu.matmul %1, %24, %cst_18 {dimension_numbers = #tpu.dot_dimension_numbers<[1], [0], [0], [1], [0, 0, 1, 1], [], []>} : vector<64x64xbf16>, vector<64x512xbf16>, vector<64x512xf32> -> vector<64x512xf32>
    %26 = arith.addf %25, %7 : vector<64x512xf32>
    %cst_19 = arith.constant 0.000000e+00 : f32
    %27 = vector.broadcast %cst_19 : f32 to vector<64x512xf32>
    %28 = arith.maximumf %26, %27 : vector<64x512xf32>
    %29 = arith.truncf %28 : vector<64x512xf32> to vector<64x512xbf16>
    %cst_20 = arith.constant dense<0.000000e+00> : vector<64x512xf32>
    %30 = tpu.matmul %1, %29, %cst_20 {dimension_numbers = #tpu.dot_dimension_numbers<[1], [0], [0], [1], [0, 0, 1, 1], [], []>} : vector<64x64xbf16>, vector<64x512xbf16>, vector<64x512xf32> -> vector<64x512xf32>
    %31 = arith.addf %30, %7 : vector<64x512xf32>
    %cst_21 = arith.constant 0.000000e+00 : f32
    %32 = vector.broadcast %cst_21 : f32 to vector<64x512xf32>
    %33 = arith.maximumf %31, %32 : vector<64x512xf32>
    %34 = arith.truncf %33 : vector<64x512xf32> to vector<64x512xbf16>
    %cst_22 = arith.constant dense<0.000000e+00> : vector<64x512xf32>
    %35 = tpu.matmul %1, %34, %cst_22 {dimension_numbers = #tpu.dot_dimension_numbers<[1], [0], [0], [1], [0, 0, 1, 1], [], []>} : vector<64x64xbf16>, vector<64x512xbf16>, vector<64x512xf32> -> vector<64x512xf32>
    %36 = arith.addf %35, %7 : vector<64x512xf32>
    %cst_23 = arith.constant 0.000000e+00 : f32
    %37 = vector.broadcast %cst_23 : f32 to vector<64x512xf32>
    %38 = arith.maximumf %36, %37 : vector<64x512xf32>
    %39 = arith.truncf %38 : vector<64x512xf32> to vector<64x512xbf16>
    %cst_24 = arith.constant dense<0.000000e+00> : vector<64x512xf32>
    %40 = tpu.matmul %1, %39, %cst_24 {dimension_numbers = #tpu.dot_dimension_numbers<[1], [0], [0], [1], [0, 0, 1, 1], [], []>} : vector<64x64xbf16>, vector<64x512xbf16>, vector<64x512xf32> -> vector<64x512xf32>
    %41 = arith.addf %40, %7 : vector<64x512xf32>
    %cst_25 = arith.constant 0.000000e+00 : f32
    %42 = vector.broadcast %cst_25 : f32 to vector<64x512xf32>
    %43 = arith.maximumf %41, %42 : vector<64x512xf32>
    %44 = arith.truncf %43 : vector<64x512xf32> to vector<64x512xbf16>
    %cst_26 = arith.constant dense<0.000000e+00> : vector<64x512xf32>
    %45 = tpu.matmul %1, %44, %cst_26 {dimension_numbers = #tpu.dot_dimension_numbers<[1], [0], [0], [1], [0, 0, 1, 1], [], []>} : vector<64x64xbf16>, vector<64x512xbf16>, vector<64x512xf32> -> vector<64x512xf32>
    %46 = arith.addf %45, %7 : vector<64x512xf32>
    %cst_27 = arith.constant 0.000000e+00 : f32
    %47 = vector.broadcast %cst_27 : f32 to vector<64x512xf32>
    %48 = arith.maximumf %46, %47 : vector<64x512xf32>
    %49 = arith.truncf %48 : vector<64x512xf32> to vector<64x512xbf16>
    %cst_28 = arith.constant dense<0.000000e+00> : vector<64x512xf32>
    %50 = tpu.matmul %1, %49, %cst_28 {dimension_numbers = #tpu.dot_dimension_numbers<[1], [0], [0], [1], [0, 0, 1, 1], [], []>} : vector<64x64xbf16>, vector<64x512xbf16>, vector<64x512xf32> -> vector<64x512xf32>
    %51 = arith.addf %50, %7 : vector<64x512xf32>
    %cst_29 = arith.constant 0.000000e+00 : f32
    %52 = vector.broadcast %cst_29 : f32 to vector<64x512xf32>
    %53 = arith.maximumf %51, %52 : vector<64x512xf32>
    %54 = arith.truncf %53 : vector<64x512xf32> to vector<64x512xbf16>
    %cst_30 = arith.constant dense<0.000000e+00> : vector<64x512xf32>
    %55 = tpu.matmul %1, %54, %cst_30 {dimension_numbers = #tpu.dot_dimension_numbers<[1], [0], [0], [1], [0, 0, 1, 1], [], []>} : vector<64x64xbf16>, vector<64x512xbf16>, vector<64x512xf32> -> vector<64x512xf32>
    %56 = arith.addf %55, %7 : vector<64x512xf32>
    %cst_31 = arith.constant 0.000000e+00 : f32
    %57 = vector.broadcast %cst_31 : f32 to vector<64x512xf32>
    %58 = arith.maximumf %56, %57 : vector<64x512xf32>
    %59 = arith.truncf %58 : vector<64x512xf32> to vector<64x512xbf16>
    %cst_32 = arith.constant dense<0.000000e+00> : vector<2x512xf32>
    %60 = tpu.matmul %2, %59, %cst_32 {dimension_numbers = #tpu.dot_dimension_numbers<[1], [0], [0], [1], [0, 0, 1, 1], [], []>} : vector<2x64xbf16>, vector<64x512xbf16>, vector<2x512xf32> -> vector<2x512xf32>
    %61 = vector.broadcast %4 : vector<2x1xf32> to vector<2x512xf32>
    %62 = arith.addf %60, %61 : vector<2x512xf32>
    %cst_33 = arith.constant dense<0xFF800000> : vector<512xf32>
    %63 = vector.multi_reduction <maximumf>, %62, %cst_33 [0] : vector<2x512xf32> to vector<512xf32>
    %64 = vector.shape_cast %63 : vector<512xf32> to vector<1x512xf32>
    %65 = vector.broadcast %64 : vector<1x512xf32> to vector<2x512xf32>
    %66 = arith.subf %62, %65 : vector<2x512xf32>
    %67 = math.exp %66 : vector<2x512xf32>
    %cst_34 = arith.constant dense<0.000000e+00> : vector<512xf32>
    %68 = vector.multi_reduction <add>, %67, %cst_34 [0] : vector<2x512xf32> to vector<512xf32>
    %69 = vector.shape_cast %68 : vector<512xf32> to vector<1x512xf32>
    %70 = tpu.reciprocal %69 {approx = true} : vector<1x512xf32> -> vector<1x512xf32>
    %71 = vector.broadcast %70 : vector<1x512xf32> to vector<2x512xf32>
    %72 = arith.mulf %67, %71 : vector<2x512xf32>
    %c0_35 = arith.constant 0 : index
    %c0_36 = arith.constant 0 : index
    %73 = vector.load %arg8[%c0_35, %c0_36] : memref<2x512xf32, #tpu.memory_space<vmem>>, vector<2x512xf32>
    tpu.vector_store %arg8[%c0_35, %c0_36], %72 {strides = array<i32>} : memref<2x512xf32, #tpu.memory_space<vmem>>, vector<2x512xf32>,
    return
  }
  func.func @transform_0(%arg0: i32) -> (i32, i32) {
    %c0_i32 = arith.constant 0 : i32
    %c0_i32_0 = arith.constant 0 : i32
    return %c0_i32, %arg0 : i32, i32
  }
  func.func @transform_1(%arg0: i32) -> (i32, i32) {
    %c0_i32 = arith.constant 0 : i32
    %c0_i32_0 = arith.constant 0 : i32
    %c0_i32_1 = arith.constant 0 : i32
    return %c0_i32, %c0_i32_0 : i32, i32
  }
  func.func @transform_2(%arg0: i32) -> (i32, i32) {
    %c0_i32 = arith.constant 0 : i32
    %c0_i32_0 = arith.constant 0 : i32
    %c0_i32_1 = arith.constant 0 : i32
    return %c0_i32, %c0_i32_0 : i32, i32
  }
  func.func @transform_3(%arg0: i32) -> (i32, i32) {
    %c0_i32 = arith.constant 0 : i32
    %c0_i32_0 = arith.constant 0 : i32
    %c0_i32_1 = arith.constant 0 : i32
    return %c0_i32, %c0_i32_0 : i32, i32
  }
  func.func @transform_4(%arg0: i32) -> (i32, i32) {
    %c0_i32 = arith.constant 0 : i32
    %c0_i32_0 = arith.constant 0 : i32
    %c0_i32_1 = arith.constant 0 : i32
    return %c0_i32, %c0_i32_0 : i32, i32
  }
  func.func @transform_5(%arg0: i32) -> (i32, i32) {
    %c0_i32 = arith.constant 0 : i32
    %c0_i32_0 = arith.constant 0 : i32
    %c0_i32_1 = arith.constant 0 : i32
    return %c0_i32, %c0_i32_0 : i32, i32
  }
  func.func @transform_6(%arg0: i32) -> (i32, i32) {
    %c0_i32 = arith.constant 0 : i32
    %c0_i32_0 = arith.constant 0 : i32
    %c0_i32_1 = arith.constant 0 : i32
    return %c0_i32, %c0_i32_0 : i32, i32
  }
  func.func @transform_7(%arg0: i32) -> (i32, i32) {
    %c0_i32 = arith.constant 0 : i32
    %c0_i32_0 = arith.constant 0 : i32
    return %c0_i32, %arg0 : i32, i32
  }
}

</mosaic_0001>

<bundles_post_ra>
// kernel: tpu_custom_call.1
= control target key start
LH: loop header
LB: loop body
LE: loop exit
PB: predicated region body
PF: predicated region fallthrough
CT: control target
= control target key end

     0   :  { %vm187_vm0 = vcmask 1043456   ;;  %v2538_v6 = vmov 0   ;;  %vm174_vm1 = vcmask 64512   ;;  %s3259_s0 = inlined_call_operand.vmem [shape: bf16[8,512], index: 0, kind: input, shape index: {}]   ;;  %s3260_s1 = inlined_call_operand.vmem [shape: bf16[64,8], index: 1, kind: input, shape index: {}]   ;;  %s3261_s2 = inlined_call_operand.vmem [shape: f32[64,1], index: 2, kind: input, shape index: {}]   ;;  %s3262_s3 = inlined_call_operand.vmem [shape: bf16[64,64], index: 3, kind: input, shape index: {}]   ;;  %s3263_s4 = inlined_call_operand.vmem [shape: f32[64,1], index: 4, kind: input, shape index: {}]   ;;  %s3264_s5 = inlined_call_operand.vmem [shape: bf16[2,64], index: 5, kind: input, shape index: {}]   ;;  %s3265_s6 = inlined_call_operand.vmem [shape: f32[2,1], index: 6, kind: input, shape index: {}]   ;;  %s3266_s7 = inlined_call_operand.hbm [shape: f32[2,512], index: 7, kind: output, shape index: {}]  }
   0x1   :  { %v102_v0 = vld [vmem:[%s3259_s0] sm:$0xff]  ;;  %v103_v1 = vld [vmem:[%s3259_s0 + $0x8] sm:$0xff]  ;;  %232 = vmatprep.mubr.bf16.mxu0 %v2538_v6  ;;  %305 = vmatprep.mubr.bf16.mxu1 %v2538_v6  ;;  %v47_v11 = vld [vmem:[%s3261_s2 + $0x10] sm:$0xff] }
   0x2   :  { %v2382_v2 = vcombine.high %v102_v0, %v102_v0  ;;  %v2384_v3 = vcombine.high %v103_v1, %v103_v1  ;;  %v2381_v4 = vcombine.low %v102_v0, %v102_v0  ;;  %v2383_v5 = vcombine.low %v103_v1, %v103_v1  ;;  %2476 = vset.pattern.permute.xlu0 %v2538_v6  ;;  %v2482_v9 = vld [vmem:[%s3260_s1] sm:$0xff]   ;;  %v46_v12 = vld [vmem:[%s3261_s2 + $0x8] sm:$0xff]  ;;  %v48_v13 = vld [vmem:[%s3261_s2 + $0x18] sm:$0xff] }
   0x3   :  { %v45_v10 = vld [vmem:[%s3261_s2] sm:$0xff]  ;;  %2477 = vset.pattern.permute.xlu1 %v2538_v6  ;;  %v2483_v14 = vld [vmem:[%s3260_s1 + $0x8] sm:$0xff]  }
   0x4   :  { %2385 = vmatprep.subr.msk.bf16.mxu0 %vm187_vm0, %v2382_v2  ;;  %2390 = vmatprep.subr.msk.bf16.mxu1 %vm187_vm0, %v2384_v3  ;;  %v189_v7 = vsel %vm187_vm0, %v2381_v4, 0  ;;  %v195_v8 = vsel %vm187_vm0, %v2383_v5, 0  ;;  %v49_v15 = vld [vmem:[%s3261_s2 + $0x20] sm:$0xff]  ;;  %v50_v16 = vld [vmem:[%s3261_s2 + $0x28] sm:$0xff] }
   0x5   :  { %201 = vmatpush1.bf16.msra.mxu0 %v189_v7  ;;  %274 = vmatpush1.bf16.msra.mxu1 %v195_v8 }
   0x6   :  { %106 = vperm.xlu0 %2476, %v45_v10   ;;  %116 = vperm.xlu1 %2477, %v47_v11  }
   0x8   :  { %2386 = vmatmul.mubr.msk.bf16.vlgmr.msra.gmra.mrb[0].mxu0 %vm174_vm1, %v2482_v9  ;;  %2391 = vmatmul.mubr.msk.bf16.vlgmr.msra.gmra.mrb[0].mxu1 %vm174_vm1, %v2482_v9 }
   0x9   :  { %242 = vmatprep.mubr.bf16.mxu0 %v2538_v6  ;;  %315 = vmatprep.mubr.bf16.mxu1 %v2538_v6 }
   0xa   :  { %111 = vperm.xlu0 %2476, %v46_v12   ;;  %121 = vperm.xlu1 %2477, %v48_v13  }
   0xe   :  { %126 = vperm.xlu0 %2476, %v49_v15  }
   0xf   :  { %12 = vsyncpa [#allocation3], 0  ;;  %v51_v17 = vld [vmem:[%s3261_s2 + $0x30] sm:$0xff]  ;;  %131 = vperm.xlu1 %2477, %v50_v16   ;;  %v52_v18 = vld [vmem:[%s3261_s2 + $0x38] sm:$0xff]  ;;  %vm414_vm2 = vcmask 523264   ;;  %vm2263_vm3 = vcmask 1041408  }
  0x10   :  { %2387 = vmatmul.mubr.msk.bf16.gmra.mrb[4].mxu0 %vm174_vm1, %v2483_v14  ;;  %2392 = vmatmul.mubr.msk.bf16.gmra.mrb[4].mxu1 %vm174_vm1, %v2483_v14  ;;  %v54_v19 = vld [vmem:[%s3263_s4] sm:$0xff]  ;;  %v2484_v20 = vld [vmem:[%s3260_s1 + $0x10] sm:$0xff]   ;;  %v55_v21 = vld [vmem:[%s3263_s4 + $0x8] sm:$0xff] }
  0x11   :  { %252 = vmatprep.mubr.bf16.mxu0 %v2538_v6  ;;  %325 = vmatprep.mubr.bf16.mxu1 %v2538_v6  ;;  %v56_v22 = vld [vmem:[%s3263_s4 + $0x10] sm:$0xff]  ;;  %v57_v23 = vld [vmem:[%s3263_s4 + $0x18] sm:$0xff]  ;;  %v58_v24 = vld [vmem:[%s3263_s4 + $0x20] sm:$0xff] }
  0x12   :  { %136 = vperm.xlu0 %2476, %v51_v17   ;;  %v2485_v25 = vld [vmem:[%s3260_s1 + $0x18] sm:$0xff]   ;;  %v59_v26 = vld [vmem:[%s3263_s4 + $0x28] sm:$0xff]  ;;  %v60_v27 = vld [vmem:[%s3263_s4 + $0x30] sm:$0xff] }
  0x13   :  { %141 = vperm.xlu1 %2477, %v52_v18   ;;  %v61_v28 = vld [vmem:[%s3263_s4 + $0x38] sm:$0xff]  ;;  %v53_v29 = vld [vmem:[%s3265_s6] sm:$0x3] }
  0x16   :  { %64 = vperm.xlu0 %2476, %v54_v19  }
  0x17   :  { %69 = vperm.xlu1 %2477, %v55_v21  }
  0x18   :  { %2388 = vmatmul.mubr.msk.bf16.gmra.mrb[8].mxu0 %vm174_vm1, %v2484_v20  ;;  %2393 = vmatmul.mubr.msk.bf16.gmra.mrb[8].mxu1 %vm174_vm1, %v2484_v20 }
  0x19   :  { %262 = vmatprep.mubr.bf16.mxu0 %v2538_v6  ;;  %335 = vmatprep.mubr.bf16.mxu1 %v2538_v6 }
  0x1a   :  { %74 = vperm.xlu0 %2476, %v56_v22  }
  0x1b   :  { %79 = vperm.xlu1 %2477, %v57_v23  }
  0x1e   :  { %84 = vperm.xlu0 %2476, %v58_v24  }
  0x1f   :  { %89 = vperm.xlu1 %2477, %v59_v26  }
  0x20   :  { %2389 = vmatmul.mubr.msk.bf16.gmra.mrb[12].mxu0 %vm174_vm1, %v2485_v25  ;;  %2394 = vmatmul.mubr.msk.bf16.gmra.mrb[12].mxu1 %vm174_vm1, %v2485_v25 }
  0x21   :  { %459 = vmatprep.mubr.bf16.mxu0 %v2538_v6  ;;  %532 = vmatprep.mubr.bf16.mxu1 %v2538_v6 }
  0x22   :  { %94 = vperm.xlu0 %2476, %v60_v27  }
  0x23   :  { %99 = vperm.xlu1 %2477, %v61_v28  }
  0x26   :  { %2175 = vperm.xlu0 %2476, %v53_v29  }
  0x85   :  { %v107_v30 = vpop.permute.xlu0 %106  ;;  %v117_v32 = vpop.permute.xlu1 %116 }
  0x89   :  { %v112_v31 = vpop.permute.xlu0 %111  ;;  %v122_v57 = vpop.permute.xlu1 %121 }
  0x8d   :  { %v127_v23 = vpop.permute.xlu0 %126 }
  0x8e   :  { %v132_v24 = vpop.permute.xlu1 %131 }
  0xdb   :  { %v234_v33 = vpop.f32.mrb[0].mxu0  ;;  %v307_v34 = vpop.f32.mrb[0].mxu1 }
  0xdc   :  { %v235_v35 = vadd.f32 %v234_v33, %v107_v30  ;;  %v308_v36 = vadd.f32 %v307_v34, %v107_v30  ;;  %v236_v37 = vpop.f32.mrb[1].mxu0  ;;  %v309_v38 = vpop.f32.mrb[1].mxu1 }
  0xdd   :  { %v237_v39 = vadd.f32 %v236_v37, %v107_v30  ;;  %v310_v40 = vadd.f32 %v309_v38, %v107_v30  ;;  %v238_v41 = vpop.f32.mrb[2].mxu0  ;;  %v311_v42 = vpop.f32.mrb[2].mxu1 }
  0xde   :  { %v239_v43 = vadd.f32 %v238_v41, %v112_v31  ;;  %v312_v44 = vadd.f32 %v311_v42, %v112_v31  ;;  %v240_v45 = vpop.f32.mrb[3].mxu0  ;;  %v313_v46 = vpop.f32.mrb[3].mxu1  ;;  %v346_v49 = vmax.f32 %v235_v35, 0.0  ;;  %v348_v50 = vmax.f32 %v308_v36, 0.0 }
  0xdf   :  { %v241_v47 = vadd.f32 %v240_v45, %v112_v31  ;;  %v314_v48 = vadd.f32 %v313_v46, %v112_v31  ;;  %v347_v53 = vmax.f32 %v237_v39, 0.0  ;;  %v349_v54 = vmax.f32 %v310_v40, 0.0 }
  0xe0   :  { %v350_v51 = vmax.f32 %v239_v43, 0.0  ;;  %v352_v52 = vmax.f32 %v312_v44, 0.0 }
  0xe1   :  { %v351_v55 = vmax.f32 %v241_v47, 0.0  ;;  %v353_v56 = vmax.f32 %v314_v48, 0.0 }
  0xe2   :  { %v378_v58 = vpack.c.bf16 %v350_v51, %v346_v49  ;;  %v380_v59 = vpack.c.bf16 %v352_v52, %v348_v50 }
  0xe3   :  { %v379_v60 = vpack.c.bf16 %v351_v55, %v347_v53  ;;  %v381_v61 = vpack.c.bf16 %v353_v56, %v349_v54  ;;  %v244_v62 = vpop.f32.mrb[4].mxu0  ;;  %v317_v63 = vpop.f32.mrb[4].mxu1 }
  0xe4   :  { %v245_v0 = vadd.f32 %v244_v62, %v117_v32  ;;  %v318_v1 = vadd.f32 %v317_v63, %v117_v32  ;;  %v246_v2 = vpop.f32.mrb[5].mxu0  ;;  %v319_v3 = vpop.f32.mrb[5].mxu1 }
  0xe5   :  { %v247_v4 = vadd.f32 %v246_v2, %v117_v32  ;;  %v320_v5 = vadd.f32 %v319_v3, %v117_v32  ;;  %v248_v7 = vpop.f32.mrb[6].mxu0  ;;  %v321_v8 = vpop.f32.mrb[6].mxu1  ;;  %427 = vmatprep.subr.bf16.mxu0 %v379_v60  ;;  %500 = vmatprep.subr.bf16.mxu1 %v381_v61 }
  0xe6   :  { %v249_v9 = vadd.f32 %v248_v7, %v122_v57  ;;  %v322_v10 = vadd.f32 %v321_v8, %v122_v57  ;;  %v250_v11 = vpop.f32.mrb[7].mxu0  ;;  %v323_v12 = vpop.f32.mrb[7].mxu1  ;;  %428 = vmatpush1.bf16.msra.mxu0 %v378_v58  ;;  %501 = vmatpush1.bf16.msra.mxu1 %v380_v59  ;;  %v354_v15 = vmax.f32 %v245_v0, 0.0  ;;  %v356_v16 = vmax.f32 %v318_v1, 0.0 }
  0xe7   :  { %v251_v13 = vadd.f32 %v250_v11, %v122_v57  ;;  %v324_v14 = vadd.f32 %v323_v12, %v122_v57  ;;  %v355_v19 = vmax.f32 %v247_v4, 0.0  ;;  %v357_v20 = vmax.f32 %v320_v5, 0.0  ;;  %v137_v53 = vpop.permute.xlu0 %136  ;;  %v142_v54 = vpop.permute.xlu1 %141 }
  0xe8   :  { %v358_v17 = vmax.f32 %v249_v9, 0.0  ;;  %v360_v18 = vmax.f32 %v322_v10, 0.0 }
  0xe9   :  { %v359_v21 = vmax.f32 %v251_v13, 0.0  ;;  %v361_v22 = vmax.f32 %v324_v14, 0.0 }
  0xea   :  { %v382_v25 = vpack.c.bf16 %v358_v17, %v354_v15  ;;  %v384_v26 = vpack.c.bf16 %v360_v18, %v356_v16 }
  0xeb   :  { %v383_v27 = vpack.c.bf16 %v359_v21, %v355_v19  ;;  %v385_v28 = vpack.c.bf16 %v361_v22, %v357_v20  ;;  %v254_v29 = vpop.f32.mrb[8].mxu0  ;;  %v327_v30 = vpop.f32.mrb[8].mxu1 }
  0xec   :  { %v255_v31 = vadd.f32 %v254_v29, %v127_v23  ;;  %v328_v32 = vadd.f32 %v327_v30, %v127_v23  ;;  %v256_v33 = vpop.f32.mrb[9].mxu0  ;;  %v329_v34 = vpop.f32.mrb[9].mxu1 }
  0xed   :  { %v257_v35 = vadd.f32 %v256_v33, %v127_v23  ;;  %v330_v36 = vadd.f32 %v329_v34, %v127_v23  ;;  %v258_v37 = vpop.f32.mrb[10].mxu0  ;;  %v331_v38 = vpop.f32.mrb[10].mxu1  ;;  %429 = vmatprep.subr.bf16.mxu0 %v383_v27  ;;  %502 = vmatprep.subr.bf16.mxu1 %v385_v28  ;;  %v2706_v27 = vld [vmem:[%s3262_s3 + $0x18] sm:$0xff]  }
  0xee   :  { %v259_v39 = vadd.f32 %v258_v37, %v132_v24  ;;  %v332_v40 = vadd.f32 %v331_v38, %v132_v24  ;;  %v260_v41 = vpop.f32.mrb[11].mxu0  ;;  %v333_v42 = vpop.f32.mrb[11].mxu1  ;;  %430 = vmatpush1.bf16.msra.mxu0 %v382_v25  ;;  %503 = vmatpush1.bf16.msra.mxu1 %v384_v26  ;;  %v362_v45 = vmax.f32 %v255_v31, 0.0  ;;  %v364_v46 = vmax.f32 %v328_v32, 0.0  ;;  %v2684_v25 = vld [vmem:[%s3262_s3 + $0x8] sm:$0xff]   ;;  %v2695_v26 = vld [vmem:[%s3262_s3 + $0x10] sm:$0xff]  }
  0xef   :  { %v261_v43 = vadd.f32 %v260_v41, %v132_v24  ;;  %v334_v44 = vadd.f32 %v333_v42, %v132_v24  ;;  %v363_v49 = vmax.f32 %v257_v35, 0.0  ;;  %v365_v50 = vmax.f32 %v330_v36, 0.0  ;;  %v2673_v24 = vld [vmem:[%s3262_s3] sm:$0xff]   ;;  %v2714_v28 = vpop.permute.xlu0 %64  ;;  %v2716_v29 = vpop.permute.xlu1 %69 }
  0xf0   :  { %v366_v47 = vmax.f32 %v259_v39, 0.0  ;;  %v368_v48 = vmax.f32 %v332_v40, 0.0 }
  0xf1   :  { %v367_v51 = vmax.f32 %v261_v43, 0.0  ;;  %v369_v52 = vmax.f32 %v334_v44, 0.0 }
  0xf2   :  { %v386_v55 = vpack.c.bf16 %v366_v47, %v362_v45  ;;  %v388_v56 = vpack.c.bf16 %v368_v48, %v364_v46 }
  0xf3   :  { %v387_v57 = vpack.c.bf16 %v367_v51, %v363_v49  ;;  %v389_v58 = vpack.c.bf16 %v369_v52, %v365_v50  ;;  %v264_v59 = vpop.f32.mrb[12].mxu0  ;;  %v337_v60 = vpop.f32.mrb[12].mxu1 }
  0xf4   :  { %v265_v61 = vadd.f32 %v264_v59, %v137_v53  ;;  %v338_v62 = vadd.f32 %v337_v60, %v137_v53  ;;  %v266_v63 = vpop.f32.mrb[13].mxu0  ;;  %v339_v0 = vpop.f32.mrb[13].mxu1 }
  0xf5   :  { %v267_v1 = vadd.f32 %v266_v63, %v137_v53  ;;  %v340_v2 = vadd.f32 %v339_v0, %v137_v53  ;;  %v268_v3 = vpop.f32.mrb[14].mxu0  ;;  %v341_v4 = vpop.f32.mrb[14].mxu1  ;;  %431 = vmatprep.subr.bf16.mxu0 %v387_v57  ;;  %504 = vmatprep.subr.bf16.mxu1 %v389_v58 }
  0xf6   :  { %v269_v5 = vadd.f32 %v268_v3, %v142_v54  ;;  %v342_v7 = vadd.f32 %v341_v4, %v142_v54  ;;  %v270_v8 = vpop.f32.mrb[15].mxu0  ;;  %v343_v9 = vpop.f32.mrb[15].mxu1  ;;  %432 = vmatpush1.bf16.msra.mxu0 %v386_v55  ;;  %505 = vmatpush1.bf16.msra.mxu1 %v388_v56  ;;  %v370_v12 = vmax.f32 %v265_v61, 0.0  ;;  %v372_v13 = vmax.f32 %v338_v62, 0.0 }
  0xf7   :  { %v271_v10 = vadd.f32 %v270_v8, %v142_v54  ;;  %v344_v11 = vadd.f32 %v343_v9, %v142_v54  ;;  %v371_v16 = vmax.f32 %v267_v1, 0.0  ;;  %v373_v17 = vmax.f32 %v340_v2, 0.0  ;;  %v2726_v54 = vpop.permute.xlu0 %74  ;;  %v2728_v55 = vpop.permute.xlu1 %79 }
  0xf8   :  { %v374_v14 = vmax.f32 %v269_v5, 0.0  ;;  %v376_v15 = vmax.f32 %v342_v7, 0.0 }
  0xf9   :  { %v375_v18 = vmax.f32 %v271_v10, 0.0  ;;  %v377_v19 = vmax.f32 %v344_v11, 0.0 }
  0xfa   :  { %v390_v20 = vpack.c.bf16 %v374_v14, %v370_v12  ;;  %v392_v21 = vpack.c.bf16 %v376_v15, %v372_v13 }
  0xfb   :  { %v391_v22 = vpack.c.bf16 %v375_v18, %v371_v16  ;;  %v393_v23 = vpack.c.bf16 %v377_v19, %v373_v17 }
  0xfd   :  { %433 = vmatprep.subr.bf16.mxu0 %v391_v22  ;;  %506 = vmatprep.subr.bf16.mxu1 %v393_v23  ;;  %v2740_v22 = vpop.permute.xlu1 %89 }
  0xfe   :  { %434 = vmatpush1.bf16.msra.mxu0 %v390_v20  ;;  %507 = vmatpush1.bf16.msra.mxu1 %v392_v21  ;;  %v2738_v21 = vpop.permute.xlu0 %84 }
 0x101   :  { %2399 = vmatmul.mubr.msk.bf16.vlgmr.msra.gmra.mrb[16].mxu0 %vm414_vm2, %v2673_v24  ;;  %2403 = vmatmul.mubr.msk.bf16.vlgmr.msra.gmra.mrb[16].mxu1 %vm414_vm2, %v2673_v24 }
 0x102   :  { %469 = vmatprep.mubr.bf16.mxu0 %v2538_v6  ;;  %542 = vmatprep.mubr.bf16.mxu1 %v2538_v6 }
 0x109   :  { %2400 = vmatmul.mubr.msk.bf16.gmra.mrb[20].mxu0 %vm414_vm2, %v2684_v25  ;;  %2404 = vmatmul.mubr.msk.bf16.gmra.mrb[20].mxu1 %vm414_vm2, %v2684_v25 }
 0x10a   :  { %479 = vmatprep.mubr.bf16.mxu0 %v2538_v6  ;;  %552 = vmatprep.mubr.bf16.mxu1 %v2538_v6 }
 0x111   :  { %2401 = vmatmul.mubr.msk.bf16.gmra.mrb[24].mxu0 %vm414_vm2, %v2695_v26  ;;  %2405 = vmatmul.mubr.msk.bf16.gmra.mrb[24].mxu1 %vm414_vm2, %v2695_v26 }
 0x112   :  { %489 = vmatprep.mubr.bf16.mxu0 %v2538_v6  ;;  %562 = vmatprep.mubr.bf16.mxu1 %v2538_v6 }
 0x119   :  { %2402 = vmatmul.mubr.msk.bf16.gmra.mrb[28].mxu0 %vm414_vm2, %v2706_v27  ;;  %2406 = vmatmul.mubr.msk.bf16.gmra.mrb[28].mxu1 %vm414_vm2, %v2706_v27 }
 0x11a   :  { %653 = vmatprep.mubr.bf16.mxu0 %v2538_v6  ;;  %726 = vmatprep.mubr.bf16.mxu1 %v2538_v6 }
 0x1d4   :  { %v461_v30 = vpop.f32.mrb[16].mxu0  ;;  %v534_v31 = vpop.f32.mrb[16].mxu1 }
 0x1d5   :  { %v462_v32 = vadd.f32 %v461_v30, %v2714_v28  ;;  %v535_v33 = vadd.f32 %v534_v31, %v2714_v28  ;;  %v463_v34 = vpop.f32.mrb[17].mxu0  ;;  %v536_v35 = vpop.f32.mrb[17].mxu1 }
 0x1d6   :  { %v464_v36 = vadd.f32 %v463_v34, %v2714_v28  ;;  %v537_v37 = vadd.f32 %v536_v35, %v2714_v28  ;;  %v465_v38 = vpop.f32.mrb[18].mxu0  ;;  %v538_v39 = vpop.f32.mrb[18].mxu1 }
 0x1d7   :  { %v466_v40 = vadd.f32 %v465_v38, %v2716_v29  ;;  %v539_v41 = vadd.f32 %v538_v39, %v2716_v29  ;;  %v467_v42 = vpop.f32.mrb[19].mxu0  ;;  %v540_v43 = vpop.f32.mrb[19].mxu1  ;;  %v573_v46 = vmax.f32 %v462_v32, 0.0  ;;  %v575_v47 = vmax.f32 %v535_v33, 0.0 }
 0x1d8   :  { %v468_v44 = vadd.f32 %v467_v42, %v2716_v29  ;;  %v541_v45 = vadd.f32 %v540_v43, %v2716_v29  ;;  %v574_v50 = vmax.f32 %v464_v36, 0.0  ;;  %v576_v51 = vmax.f32 %v537_v37, 0.0 }
 0x1d9   :  { %v577_v48 = vmax.f32 %v466_v40, 0.0  ;;  %v579_v49 = vmax.f32 %v539_v41, 0.0 }
 0x1da   :  { %v578_v52 = vmax.f32 %v468_v44, 0.0  ;;  %v580_v53 = vmax.f32 %v541_v45, 0.0 }
 0x1db   :  { %v605_v56 = vpack.c.bf16 %v577_v48, %v573_v46  ;;  %v607_v57 = vpack.c.bf16 %v579_v49, %v575_v47 }
 0x1dc   :  { %v606_v58 = vpack.c.bf16 %v578_v52, %v574_v50  ;;  %v608_v59 = vpack.c.bf16 %v580_v53, %v576_v51  ;;  %v471_v60 = vpop.f32.mrb[20].mxu0  ;;  %v544_v61 = vpop.f32.mrb[20].mxu1 }
 0x1dd   :  { %v472_v62 = vadd.f32 %v471_v60, %v2726_v54  ;;  %v545_v63 = vadd.f32 %v544_v61, %v2726_v54  ;;  %v473_v0 = vpop.f32.mrb[21].mxu0  ;;  %v546_v1 = vpop.f32.mrb[21].mxu1 }
 0x1de   :  { %v474_v2 = vadd.f32 %v473_v0, %v2726_v54  ;;  %v547_v3 = vadd.f32 %v546_v1, %v2726_v54  ;;  %v475_v4 = vpop.f32.mrb[22].mxu0  ;;  %v548_v5 = vpop.f32.mrb[22].mxu1  ;;  %621 = vmatprep.subr.bf16.mxu0 %v606_v58  ;;  %694 = vmatprep.subr.bf16.mxu1 %v608_v59 }
 0x1df   :  { %v476_v7 = vadd.f32 %v475_v4, %v2728_v55  ;;  %v549_v8 = vadd.f32 %v548_v5, %v2728_v55  ;;  %v477_v9 = vpop.f32.mrb[23].mxu0  ;;  %v550_v10 = vpop.f32.mrb[23].mxu1  ;;  %622 = vmatpush1.bf16.msra.mxu0 %v605_v56  ;;  %695 = vmatpush1.bf16.msra.mxu1 %v607_v57  ;;  %v581_v13 = vmax.f32 %v472_v62, 0.0  ;;  %v583_v14 = vmax.f32 %v545_v63, 0.0 }
 0x1e0   :  { %v478_v11 = vadd.f32 %v477_v9, %v2728_v55  ;;  %v551_v12 = vadd.f32 %v550_v10, %v2728_v55  ;;  %v582_v17 = vmax.f32 %v474_v2, 0.0  ;;  %v584_v18 = vmax.f32 %v547_v3, 0.0  ;;  %v2750_v59 = vpop.permute.xlu0 %94  ;;  %v2752_v60 = vpop.permute.xlu1 %99 }
 0x1e1   :  { %v585_v15 = vmax.f32 %v476_v7, 0.0  ;;  %v587_v16 = vmax.f32 %v549_v8, 0.0 }
 0x1e2   :  { %v586_v19 = vmax.f32 %v478_v11, 0.0  ;;  %v588_v20 = vmax.f32 %v551_v12, 0.0 }
 0x1e3   :  { %v609_v23 = vpack.c.bf16 %v585_v15, %v581_v13  ;;  %v611_v30 = vpack.c.bf16 %v587_v16, %v583_v14 }
 0x1e4   :  { %v610_v31 = vpack.c.bf16 %v586_v19, %v582_v17  ;;  %v612_v32 = vpack.c.bf16 %v588_v20, %v584_v18  ;;  %v481_v33 = vpop.f32.mrb[24].mxu0  ;;  %v554_v34 = vpop.f32.mrb[24].mxu1 }
 0x1e5   :  { %v482_v35 = vadd.f32 %v481_v33, %v2738_v21  ;;  %v555_v36 = vadd.f32 %v554_v34, %v2738_v21  ;;  %v483_v37 = vpop.f32.mrb[25].mxu0  ;;  %v556_v38 = vpop.f32.mrb[25].mxu1 }
 0x1e6   :  { %v484_v39 = vadd.f32 %v483_v37, %v2738_v21  ;;  %v557_v40 = vadd.f32 %v556_v38, %v2738_v21  ;;  %v485_v41 = vpop.f32.mrb[26].mxu0  ;;  %v558_v42 = vpop.f32.mrb[26].mxu1  ;;  %623 = vmatprep.subr.bf16.mxu0 %v610_v31  ;;  %696 = vmatprep.subr.bf16.mxu1 %v612_v32 }
 0x1e7   :  { %v486_v43 = vadd.f32 %v485_v41, %v2740_v22  ;;  %v559_v44 = vadd.f32 %v558_v42, %v2740_v22  ;;  %v487_v45 = vpop.f32.mrb[27].mxu0  ;;  %v560_v46 = vpop.f32.mrb[27].mxu1  ;;  %624 = vmatpush1.bf16.msra.mxu0 %v609_v23  ;;  %697 = vmatpush1.bf16.msra.mxu1 %v611_v30  ;;  %v589_v49 = vmax.f32 %v482_v35, 0.0  ;;  %v591_v50 = vmax.f32 %v555_v36, 0.0 }
 0x1e8   :  { %v488_v47 = vadd.f32 %v487_v45, %v2740_v22  ;;  %v561_v48 = vadd.f32 %v560_v46, %v2740_v22  ;;  %v590_v53 = vmax.f32 %v484_v39, 0.0  ;;  %v592_v56 = vmax.f32 %v557_v40, 0.0 }
 0x1e9   :  { %v593_v51 = vmax.f32 %v486_v43, 0.0  ;;  %v595_v52 = vmax.f32 %v559_v44, 0.0 }
 0x1ea   :  { %v594_v57 = vmax.f32 %v488_v47, 0.0  ;;  %v596_v58 = vmax.f32 %v561_v48, 0.0 }
 0x1eb   :  { %v613_v61 = vpack.c.bf16 %v593_v51, %v589_v49  ;;  %v615_v62 = vpack.c.bf16 %v595_v52, %v591_v50 }
 0x1ec   :  { %v614_v63 = vpack.c.bf16 %v594_v57, %v590_v53  ;;  %v616_v0 = vpack.c.bf16 %v596_v58, %v592_v56  ;;  %v491_v1 = vpop.f32.mrb[28].mxu0  ;;  %v564_v2 = vpop.f32.mrb[28].mxu1 }
 0x1ed   :  { %v492_v3 = vadd.f32 %v491_v1, %v2750_v59  ;;  %v565_v4 = vadd.f32 %v564_v2, %v2750_v59  ;;  %v493_v5 = vpop.f32.mrb[29].mxu0  ;;  %v566_v7 = vpop.f32.mrb[29].mxu1 }
 0x1ee   :  { %v494_v8 = vadd.f32 %v493_v5, %v2750_v59  ;;  %v567_v9 = vadd.f32 %v566_v7, %v2750_v59  ;;  %v495_v10 = vpop.f32.mrb[30].mxu0  ;;  %v568_v11 = vpop.f32.mrb[30].mxu1  ;;  %625 = vmatprep.subr.bf16.mxu0 %v614_v63  ;;  %698 = vmatprep.subr.bf16.mxu1 %v616_v0 }
 0x1ef   :  { %v496_v12 = vadd.f32 %v495_v10, %v2752_v60  ;;  %v569_v13 = vadd.f32 %v568_v11, %v2752_v60  ;;  %v497_v14 = vpop.f32.mrb[31].mxu0  ;;  %v570_v15 = vpop.f32.mrb[31].mxu1  ;;  %626 = vmatpush1.bf16.msra.mxu0 %v613_v61  ;;  %699 = vmatpush1.bf16.msra.mxu1 %v615_v62  ;;  %v597_v18 = vmax.f32 %v492_v3, 0.0  ;;  %v599_v19 = vmax.f32 %v565_v4, 0.0 }
 0x1f0   :  { %v498_v16 = vadd.f32 %v497_v14, %v2752_v60  ;;  %v571_v17 = vadd.f32 %v570_v15, %v2752_v60  ;;  %v598_v30 = vmax.f32 %v494_v8, 0.0  ;;  %v600_v31 = vmax.f32 %v567_v9, 0.0 }
 0x1f1   :  { %v601_v20 = vmax.f32 %v496_v12, 0.0  ;;  %v603_v23 = vmax.f32 %v569_v13, 0.0 }
 0x1f2   :  { %v602_v32 = vmax.f32 %v498_v16, 0.0  ;;  %v604_v33 = vmax.f32 %v571_v17, 0.0 }
 0x1f3   :  { %v617_v34 = vpack.c.bf16 %v601_v20, %v597_v18  ;;  %v619_v35 = vpack.c.bf16 %v603_v23, %v599_v19 }
 0x1f4   :  { %v618_v36 = vpack.c.bf16 %v602_v32, %v598_v30  ;;  %v620_v37 = vpack.c.bf16 %v604_v33, %v600_v31 }
 0x1f6   :  { %627 = vmatprep.subr.bf16.mxu0 %v618_v36  ;;  %700 = vmatprep.subr.bf16.mxu1 %v620_v37 }
 0x1f7   :  { %628 = vmatpush1.bf16.msra.mxu0 %v617_v34  ;;  %701 = vmatpush1.bf16.msra.mxu1 %v619_v35 }
 0x1fa   :  { %2407 = vmatmul.mubr.msk.bf16.vlgmr.msra.gmra.mrb[32].mxu0 %vm414_vm2, %v2673_v24  ;;  %2411 = vmatmul.mubr.msk.bf16.vlgmr.msra.gmra.mrb[32].mxu1 %vm414_vm2, %v2673_v24 }
 0x1fb   :  { %663 = vmatprep.mubr.bf16.mxu0 %v2538_v6  ;;  %736 = vmatprep.mubr.bf16.mxu1 %v2538_v6 }
 0x202   :  { %2408 = vmatmul.mubr.msk.bf16.gmra.mrb[36].mxu0 %vm414_vm2, %v2684_v25  ;;  %2412 = vmatmul.mubr.msk.bf16.gmra.mrb[36].mxu1 %vm414_vm2, %v2684_v25 }
 0x203   :  { %673 = vmatprep.mubr.bf16.mxu0 %v2538_v6  ;;  %746 = vmatprep.mubr.bf16.mxu1 %v2538_v6 }
 0x20a   :  { %2409 = vmatmul.mubr.msk.bf16.gmra.mrb[40].mxu0 %vm414_vm2, %v2695_v26  ;;  %2413 = vmatmul.mubr.msk.bf16.gmra.mrb[40].mxu1 %vm414_vm2, %v2695_v26 }
 0x20b   :  { %683 = vmatprep.mubr.bf16.mxu0 %v2538_v6  ;;  %756 = vmatprep.mubr.bf16.mxu1 %v2538_v6 }
 0x212   :  { %2410 = vmatmul.mubr.msk.bf16.gmra.mrb[44].mxu0 %vm414_vm2, %v2706_v27  ;;  %2414 = vmatmul.mubr.msk.bf16.gmra.mrb[44].mxu1 %vm414_vm2, %v2706_v27 }
 0x213   :  { %847 = vmatprep.mubr.bf16.mxu0 %v2538_v6  ;;  %920 = vmatprep.mubr.bf16.mxu1 %v2538_v6 }
 0x2cd   :  { %v655_v38 = vpop.f32.mrb[32].mxu0  ;;  %v728_v39 = vpop.f32.mrb[32].mxu1 }
 0x2ce   :  { %v656_v40 = vadd.f32 %v655_v38, %v2714_v28  ;;  %v729_v41 = vadd.f32 %v728_v39, %v2714_v28  ;;  %v657_v42 = vpop.f32.mrb[33].mxu0  ;;  %v730_v43 = vpop.f32.mrb[33].mxu1 }
 0x2cf   :  { %v658_v44 = vadd.f32 %v657_v42, %v2714_v28  ;;  %v731_v45 = vadd.f32 %v730_v43, %v2714_v28  ;;  %v659_v46 = vpop.f32.mrb[34].mxu0  ;;  %v732_v47 = vpop.f32.mrb[34].mxu1 }
 0x2d0   :  { %v660_v48 = vadd.f32 %v659_v46, %v2716_v29  ;;  %v733_v49 = vadd.f32 %v732_v47, %v2716_v29  ;;  %v661_v50 = vpop.f32.mrb[35].mxu0  ;;  %v734_v51 = vpop.f32.mrb[35].mxu1  ;;  %v767_v56 = vmax.f32 %v656_v40, 0.0  ;;  %v769_v57 = vmax.f32 %v729_v41, 0.0 }
 0x2d1   :  { %v662_v52 = vadd.f32 %v661_v50, %v2716_v29  ;;  %v735_v53 = vadd.f32 %v734_v51, %v2716_v29  ;;  %v768_v62 = vmax.f32 %v658_v44, 0.0  ;;  %v770_v63 = vmax.f32 %v731_v45, 0.0 }
 0x2d2   :  { %v771_v58 = vmax.f32 %v660_v48, 0.0  ;;  %v773_v61 = vmax.f32 %v733_v49, 0.0 }
 0x2d3   :  { %v772_v0 = vmax.f32 %v662_v52, 0.0  ;;  %v774_v1 = vmax.f32 %v735_v53, 0.0 }
 0x2d4   :  { %v799_v2 = vpack.c.bf16 %v771_v58, %v767_v56  ;;  %v801_v3 = vpack.c.bf16 %v773_v61, %v769_v57 }
 0x2d5   :  { %v800_v4 = vpack.c.bf16 %v772_v0, %v768_v62  ;;  %v802_v5 = vpack.c.bf16 %v774_v1, %v770_v63  ;;  %v665_v7 = vpop.f32.mrb[36].mxu0  ;;  %v738_v8 = vpop.f32.mrb[36].mxu1 }
 0x2d6   :  { %v666_v9 = vadd.f32 %v665_v7, %v2726_v54  ;;  %v739_v10 = vadd.f32 %v738_v8, %v2726_v54  ;;  %v667_v11 = vpop.f32.mrb[37].mxu0  ;;  %v740_v12 = vpop.f32.mrb[37].mxu1 }
 0x2d7   :  { %v668_v13 = vadd.f32 %v667_v11, %v2726_v54  ;;  %v741_v14 = vadd.f32 %v740_v12, %v2726_v54  ;;  %v669_v15 = vpop.f32.mrb[38].mxu0  ;;  %v742_v16 = vpop.f32.mrb[38].mxu1  ;;  %815 = vmatprep.subr.bf16.mxu0 %v800_v4  ;;  %888 = vmatprep.subr.bf16.mxu1 %v802_v5 }
 0x2d8   :  { %v670_v17 = vadd.f32 %v669_v15, %v2728_v55  ;;  %v743_v18 = vadd.f32 %v742_v16, %v2728_v55  ;;  %v671_v19 = vpop.f32.mrb[39].mxu0  ;;  %v744_v20 = vpop.f32.mrb[39].mxu1  ;;  %816 = vmatpush1.bf16.msra.mxu0 %v799_v2  ;;  %889 = vmatpush1.bf16.msra.mxu1 %v801_v3  ;;  %v775_v31 = vmax.f32 %v666_v9, 0.0  ;;  %v777_v32 = vmax.f32 %v739_v10, 0.0 }
 0x2d9   :  { %v672_v23 = vadd.f32 %v671_v19, %v2728_v55  ;;  %v745_v30 = vadd.f32 %v744_v20, %v2728_v55  ;;  %v776_v35 = vmax.f32 %v668_v13, 0.0  ;;  %v778_v36 = vmax.f32 %v741_v14, 0.0 }
 0x2da   :  { %v779_v33 = vmax.f32 %v670_v17, 0.0  ;;  %v781_v34 = vmax.f32 %v743_v18, 0.0 }
 0x2db   :  { %v780_v37 = vmax.f32 %v672_v23, 0.0  ;;  %v782_v38 = vmax.f32 %v745_v30, 0.0 }
 0x2dc   :  { %v803_v39 = vpack.c.bf16 %v779_v33, %v775_v31  ;;  %v805_v40 = vpack.c.bf16 %v781_v34, %v777_v32 }
 0x2dd   :  { %v804_v41 = vpack.c.bf16 %v780_v37, %v776_v35  ;;  %v806_v42 = vpack.c.bf16 %v782_v38, %v778_v36  ;;  %v675_v43 = vpop.f32.mrb[40].mxu0  ;;  %v748_v44 = vpop.f32.mrb[40].mxu1 }
 0x2de   :  { %v676_v45 = vadd.f32 %v675_v43, %v2738_v21  ;;  %v749_v46 = vadd.f32 %v748_v44, %v2738_v21  ;;  %v677_v47 = vpop.f32.mrb[41].mxu0  ;;  %v750_v48 = vpop.f32.mrb[41].mxu1 }
 0x2df   :  { %v678_v49 = vadd.f32 %v677_v47, %v2738_v21  ;;  %v751_v50 = vadd.f32 %v750_v48, %v2738_v21  ;;  %v679_v51 = vpop.f32.mrb[42].mxu0  ;;  %v752_v52 = vpop.f32.mrb[42].mxu1  ;;  %817 = vmatprep.subr.bf16.mxu0 %v804_v41  ;;  %890 = vmatprep.subr.bf16.mxu1 %v806_v42 }
 0x2e0   :  { %v680_v53 = vadd.f32 %v679_v51, %v2740_v22  ;;  %v753_v56 = vadd.f32 %v752_v52, %v2740_v22  ;;  %v681_v57 = vpop.f32.mrb[43].mxu0  ;;  %v754_v58 = vpop.f32.mrb[43].mxu1  ;;  %818 = vmatpush1.bf16.msra.mxu0 %v803_v39  ;;  %891 = vmatpush1.bf16.msra.mxu1 %v805_v40  ;;  %v783_v63 = vmax.f32 %v676_v45, 0.0  ;;  %v785_v0 = vmax.f32 %v749_v46, 0.0 }
 0x2e1   :  { %v682_v61 = vadd.f32 %v681_v57, %v2740_v22  ;;  %v755_v62 = vadd.f32 %v754_v58, %v2740_v22  ;;  %v784_v3 = vmax.f32 %v678_v49, 0.0  ;;  %v786_v4 = vmax.f32 %v751_v50, 0.0 }
 0x2e2   :  { %v787_v1 = vmax.f32 %v680_v53, 0.0  ;;  %v789_v2 = vmax.f32 %v753_v56, 0.0 }
 0x2e3   :  { %v788_v5 = vmax.f32 %v682_v61, 0.0  ;;  %v790_v7 = vmax.f32 %v755_v62, 0.0 }
 0x2e4   :  { %v807_v8 = vpack.c.bf16 %v787_v1, %v783_v63  ;;  %v809_v9 = vpack.c.bf16 %v789_v2, %v785_v0 }
 0x2e5   :  { %v808_v10 = vpack.c.bf16 %v788_v5, %v784_v3  ;;  %v810_v11 = vpack.c.bf16 %v790_v7, %v786_v4  ;;  %v685_v12 = vpop.f32.mrb[44].mxu0  ;;  %v758_v13 = vpop.f32.mrb[44].mxu1 }
 0x2e6   :  { %v686_v14 = vadd.f32 %v685_v12, %v2750_v59  ;;  %v759_v15 = vadd.f32 %v758_v13, %v2750_v59  ;;  %v687_v16 = vpop.f32.mrb[45].mxu0  ;;  %v760_v17 = vpop.f32.mrb[45].mxu1 }
 0x2e7   :  { %v688_v18 = vadd.f32 %v687_v16, %v2750_v59  ;;  %v761_v19 = vadd.f32 %v760_v17, %v2750_v59  ;;  %v689_v20 = vpop.f32.mrb[46].mxu0  ;;  %v762_v23 = vpop.f32.mrb[46].mxu1  ;;  %819 = vmatprep.subr.bf16.mxu0 %v808_v10  ;;  %892 = vmatprep.subr.bf16.mxu1 %v810_v11 }
 0x2e8   :  { %v690_v30 = vadd.f32 %v689_v20, %v2752_v60  ;;  %v763_v31 = vadd.f32 %v762_v23, %v2752_v60  ;;  %v691_v32 = vpop.f32.mrb[47].mxu0  ;;  %v764_v33 = vpop.f32.mrb[47].mxu1  ;;  %820 = vmatpush1.bf16.msra.mxu0 %v807_v8  ;;  %893 = vmatpush1.bf16.msra.mxu1 %v809_v9  ;;  %v791_v36 = vmax.f32 %v686_v14, 0.0  ;;  %v793_v37 = vmax.f32 %v759_v15, 0.0 }
 0x2e9   :  { %v692_v34 = vadd.f32 %v691_v32, %v2752_v60  ;;  %v765_v35 = vadd.f32 %v764_v33, %v2752_v60  ;;  %v792_v40 = vmax.f32 %v688_v18, 0.0  ;;  %v794_v41 = vmax.f32 %v761_v19, 0.0 }
 0x2ea   :  { %v795_v38 = vmax.f32 %v690_v30, 0.0  ;;  %v797_v39 = vmax.f32 %v763_v31, 0.0 }
 0x2eb   :  { %v796_v42 = vmax.f32 %v692_v34, 0.0  ;;  %v798_v43 = vmax.f32 %v765_v35, 0.0 }
 0x2ec   :  { %v811_v44 = vpack.c.bf16 %v795_v38, %v791_v36  ;;  %v813_v45 = vpack.c.bf16 %v797_v39, %v793_v37 }
 0x2ed   :  { %v812_v46 = vpack.c.bf16 %v796_v42, %v792_v40  ;;  %v814_v47 = vpack.c.bf16 %v798_v43, %v794_v41 }
 0x2ef   :  { %821 = vmatprep.subr.bf16.mxu0 %v812_v46  ;;  %894 = vmatprep.subr.bf16.mxu1 %v814_v47 }
 0x2f0   :  { %822 = vmatpush1.bf16.msra.mxu0 %v811_v44  ;;  %895 = vmatpush1.bf16.msra.mxu1 %v813_v45 }
 0x2f3   :  { %2415 = vmatmul.mubr.msk.bf16.vlgmr.msra.gmra.mrb[48].mxu0 %vm414_vm2, %v2673_v24  ;;  %2419 = vmatmul.mubr.msk.bf16.vlgmr.msra.gmra.mrb[48].mxu1 %vm414_vm2, %v2673_v24 }
 0x2f4   :  { %857 = vmatprep.mubr.bf16.mxu0 %v2538_v6  ;;  %930 = vmatprep.mubr.bf16.mxu1 %v2538_v6 }
 0x2fb   :  { %2416 = vmatmul.mubr.msk.bf16.gmra.mrb[52].mxu0 %vm414_vm2, %v2684_v25  ;;  %2420 = vmatmul.mubr.msk.bf16.gmra.mrb[52].mxu1 %vm414_vm2, %v2684_v25 }
 0x2fc   :  { %867 = vmatprep.mubr.bf16.mxu0 %v2538_v6  ;;  %940 = vmatprep.mubr.bf16.mxu1 %v2538_v6 }
 0x303   :  { %2417 = vmatmul.mubr.msk.bf16.gmra.mrb[56].mxu0 %vm414_vm2, %v2695_v26  ;;  %2421 = vmatmul.mubr.msk.bf16.gmra.mrb[56].mxu1 %vm414_vm2, %v2695_v26 }
 0x304   :  { %877 = vmatprep.mubr.bf16.mxu0 %v2538_v6  ;;  %950 = vmatprep.mubr.bf16.mxu1 %v2538_v6 }
 0x30b   :  { %2418 = vmatmul.mubr.msk.bf16.gmra.mrb[60].mxu0 %vm414_vm2, %v2706_v27  ;;  %2422 = vmatmul.mubr.msk.bf16.gmra.mrb[60].mxu1 %vm414_vm2, %v2706_v27 }
 0x30c   :  { %1041 = vmatprep.mubr.bf16.mxu0 %v2538_v6  ;;  %1114 = vmatprep.mubr.bf16.mxu1 %v2538_v6 }
 0x3c6   :  { %v849_v48 = vpop.f32.mrb[48].mxu0  ;;  %v922_v49 = vpop.f32.mrb[48].mxu1 }
 0x3c7   :  { %v850_v50 = vadd.f32 %v849_v48, %v2714_v28  ;;  %v923_v51 = vadd.f32 %v922_v49, %v2714_v28  ;;  %v851_v52 = vpop.f32.mrb[49].mxu0  ;;  %v924_v53 = vpop.f32.mrb[49].mxu1 }
 0x3c8   :  { %v852_v56 = vadd.f32 %v851_v52, %v2714_v28  ;;  %v925_v57 = vadd.f32 %v924_v53, %v2714_v28  ;;  %v853_v58 = vpop.f32.mrb[50].mxu0  ;;  %v926_v61 = vpop.f32.mrb[50].mxu1 }
 0x3c9   :  { %v854_v62 = vadd.f32 %v853_v58, %v2716_v29  ;;  %v927_v63 = vadd.f32 %v926_v61, %v2716_v29  ;;  %v855_v0 = vpop.f32.mrb[51].mxu0  ;;  %v928_v1 = vpop.f32.mrb[51].mxu1  ;;  %v961_v4 = vmax.f32 %v850_v50, 0.0  ;;  %v963_v5 = vmax.f32 %v923_v51, 0.0 }
 0x3ca   :  { %v856_v2 = vadd.f32 %v855_v0, %v2716_v29  ;;  %v929_v3 = vadd.f32 %v928_v1, %v2716_v29  ;;  %v962_v9 = vmax.f32 %v852_v56, 0.0  ;;  %v964_v10 = vmax.f32 %v925_v57, 0.0 }
 0x3cb   :  { %v965_v7 = vmax.f32 %v854_v62, 0.0  ;;  %v967_v8 = vmax.f32 %v927_v63, 0.0 }
 0x3cc   :  { %v966_v11 = vmax.f32 %v856_v2, 0.0  ;;  %v968_v12 = vmax.f32 %v929_v3, 0.0 }
 0x3cd   :  { %v993_v13 = vpack.c.bf16 %v965_v7, %v961_v4  ;;  %v995_v14 = vpack.c.bf16 %v967_v8, %v963_v5 }
 0x3ce   :  { %v994_v15 = vpack.c.bf16 %v966_v11, %v962_v9  ;;  %v996_v16 = vpack.c.bf16 %v968_v12, %v964_v10  ;;  %v859_v17 = vpop.f32.mrb[52].mxu0  ;;  %v932_v18 = vpop.f32.mrb[52].mxu1 }
 0x3cf   :  { %v860_v19 = vadd.f32 %v859_v17, %v2726_v54  ;;  %v933_v20 = vadd.f32 %v932_v18, %v2726_v54  ;;  %v861_v23 = vpop.f32.mrb[53].mxu0  ;;  %v934_v30 = vpop.f32.mrb[53].mxu1 }
 0x3d0   :  { %v862_v31 = vadd.f32 %v861_v23, %v2726_v54  ;;  %v935_v32 = vadd.f32 %v934_v30, %v2726_v54  ;;  %v863_v33 = vpop.f32.mrb[54].mxu0  ;;  %v936_v34 = vpop.f32.mrb[54].mxu1  ;;  %1009 = vmatprep.subr.bf16.mxu0 %v994_v15  ;;  %1082 = vmatprep.subr.bf16.mxu1 %v996_v16 }
 0x3d1   :  { %v864_v35 = vadd.f32 %v863_v33, %v2728_v55  ;;  %v937_v36 = vadd.f32 %v936_v34, %v2728_v55  ;;  %v865_v37 = vpop.f32.mrb[55].mxu0  ;;  %v938_v38 = vpop.f32.mrb[55].mxu1  ;;  %1010 = vmatpush1.bf16.msra.mxu0 %v993_v13  ;;  %1083 = vmatpush1.bf16.msra.mxu1 %v995_v14  ;;  %v969_v41 = vmax.f32 %v860_v19, 0.0  ;;  %v971_v42 = vmax.f32 %v933_v20, 0.0 }
 0x3d2   :  { %v866_v39 = vadd.f32 %v865_v37, %v2728_v55  ;;  %v939_v40 = vadd.f32 %v938_v38, %v2728_v55  ;;  %v970_v45 = vmax.f32 %v862_v31, 0.0  ;;  %v972_v46 = vmax.f32 %v935_v32, 0.0 }
 0x3d3   :  { %v973_v43 = vmax.f32 %v864_v35, 0.0  ;;  %v975_v44 = vmax.f32 %v937_v36, 0.0 }
 0x3d4   :  { %v974_v47 = vmax.f32 %v866_v39, 0.0  ;;  %v976_v48 = vmax.f32 %v939_v40, 0.0 }
 0x3d5   :  { %v997_v49 = vpack.c.bf16 %v973_v43, %v969_v41  ;;  %v999_v50 = vpack.c.bf16 %v975_v44, %v971_v42 }
 0x3d6   :  { %v998_v51 = vpack.c.bf16 %v974_v47, %v970_v45  ;;  %v1000_v52 = vpack.c.bf16 %v976_v48, %v972_v46  ;;  %v869_v53 = vpop.f32.mrb[56].mxu0  ;;  %v942_v56 = vpop.f32.mrb[56].mxu1 }
 0x3d7   :  { %v870_v57 = vadd.f32 %v869_v53, %v2738_v21  ;;  %v943_v58 = vadd.f32 %v942_v56, %v2738_v21  ;;  %v871_v61 = vpop.f32.mrb[57].mxu0  ;;  %v944_v62 = vpop.f32.mrb[57].mxu1 }
 0x3d8   :  { %v872_v63 = vadd.f32 %v871_v61, %v2738_v21  ;;  %v945_v0 = vadd.f32 %v944_v62, %v2738_v21  ;;  %v873_v1 = vpop.f32.mrb[58].mxu0  ;;  %v946_v2 = vpop.f32.mrb[58].mxu1  ;;  %1011 = vmatprep.subr.bf16.mxu0 %v998_v51  ;;  %1084 = vmatprep.subr.bf16.mxu1 %v1000_v52 }
 0x3d9   :  { %v874_v3 = vadd.f32 %v873_v1, %v2740_v22  ;;  %v947_v4 = vadd.f32 %v946_v2, %v2740_v22  ;;  %v875_v5 = vpop.f32.mrb[59].mxu0  ;;  %v948_v7 = vpop.f32.mrb[59].mxu1  ;;  %1012 = vmatpush1.bf16.msra.mxu0 %v997_v49  ;;  %1085 = vmatpush1.bf16.msra.mxu1 %v999_v50  ;;  %v977_v10 = vmax.f32 %v870_v57, 0.0  ;;  %v979_v11 = vmax.f32 %v943_v58, 0.0 }
 0x3da   :  { %v876_v8 = vadd.f32 %v875_v5, %v2740_v22  ;;  %v949_v9 = vadd.f32 %v948_v7, %v2740_v22  ;;  %v978_v14 = vmax.f32 %v872_v63, 0.0  ;;  %v980_v15 = vmax.f32 %v945_v0, 0.0 }
 0x3db   :  { %v981_v12 = vmax.f32 %v874_v3, 0.0  ;;  %v983_v13 = vmax.f32 %v947_v4, 0.0 }
 0x3dc   :  { %v982_v16 = vmax.f32 %v876_v8, 0.0  ;;  %v984_v17 = vmax.f32 %v949_v9, 0.0 }
 0x3dd   :  { %v1001_v18 = vpack.c.bf16 %v981_v12, %v977_v10  ;;  %v1003_v19 = vpack.c.bf16 %v983_v13, %v979_v11 }
 0x3de   :  { %v1002_v20 = vpack.c.bf16 %v982_v16, %v978_v14  ;;  %v1004_v23 = vpack.c.bf16 %v984_v17, %v980_v15  ;;  %v879_v30 = vpop.f32.mrb[60].mxu0  ;;  %v952_v31 = vpop.f32.mrb[60].mxu1 }
 0x3df   :  { %v880_v32 = vadd.f32 %v879_v30, %v2750_v59  ;;  %v953_v33 = vadd.f32 %v952_v31, %v2750_v59  ;;  %v881_v34 = vpop.f32.mrb[61].mxu0  ;;  %v954_v35 = vpop.f32.mrb[61].mxu1 }
 0x3e0   :  { %v882_v36 = vadd.f32 %v881_v34, %v2750_v59  ;;  %v955_v37 = vadd.f32 %v954_v35, %v2750_v59  ;;  %v883_v38 = vpop.f32.mrb[62].mxu0  ;;  %v956_v39 = vpop.f32.mrb[62].mxu1  ;;  %1013 = vmatprep.subr.bf16.mxu0 %v1002_v20  ;;  %1086 = vmatprep.subr.bf16.mxu1 %v1004_v23 }
 0x3e1   :  { %v884_v40 = vadd.f32 %v883_v38, %v2752_v60  ;;  %v957_v41 = vadd.f32 %v956_v39, %v2752_v60  ;;  %v885_v42 = vpop.f32.mrb[63].mxu0  ;;  %v958_v43 = vpop.f32.mrb[63].mxu1  ;;  %1014 = vmatpush1.bf16.msra.mxu0 %v1001_v18  ;;  %1087 = vmatpush1.bf16.msra.mxu1 %v1003_v19  ;;  %v985_v46 = vmax.f32 %v880_v32, 0.0  ;;  %v987_v47 = vmax.f32 %v953_v33, 0.0 }
 0x3e2   :  { %v886_v44 = vadd.f32 %v885_v42, %v2752_v60  ;;  %v959_v45 = vadd.f32 %v958_v43, %v2752_v60  ;;  %v986_v50 = vmax.f32 %v882_v36, 0.0  ;;  %v988_v51 = vmax.f32 %v955_v37, 0.0 }
 0x3e3   :  { %v989_v48 = vmax.f32 %v884_v40, 0.0  ;;  %v991_v49 = vmax.f32 %v957_v41, 0.0 }
 0x3e4   :  { %v990_v52 = vmax.f32 %v886_v44, 0.0  ;;  %v992_v53 = vmax.f32 %v959_v45, 0.0 }
 0x3e5   :  { %v1005_v56 = vpack.c.bf16 %v989_v48, %v985_v46  ;;  %v1007_v57 = vpack.c.bf16 %v991_v49, %v987_v47 }
 0x3e6   :  { %v1006_v58 = vpack.c.bf16 %v990_v52, %v986_v50  ;;  %v1008_v61 = vpack.c.bf16 %v992_v53, %v988_v51 }
 0x3e8   :  { %1015 = vmatprep.subr.bf16.mxu0 %v1006_v58  ;;  %1088 = vmatprep.subr.bf16.mxu1 %v1008_v61 }
 0x3e9   :  { %1016 = vmatpush1.bf16.msra.mxu0 %v1005_v56  ;;  %1089 = vmatpush1.bf16.msra.mxu1 %v1007_v57 }
 0x3ec   :  { %2423 = vmatmul.mubr.msk.bf16.vlgmr.msra.gmra.mrb[64].mxu0 %vm414_vm2, %v2673_v24  ;;  %2427 = vmatmul.mubr.msk.bf16.vlgmr.msra.gmra.mrb[64].mxu1 %vm414_vm2, %v2673_v24 }
 0x3ed   :  { %1051 = vmatprep.mubr.bf16.mxu0 %v2538_v6  ;;  %1124 = vmatprep.mubr.bf16.mxu1 %v2538_v6 }
 0x3f4   :  { %2424 = vmatmul.mubr.msk.bf16.gmra.mrb[68].mxu0 %vm414_vm2, %v2684_v25  ;;  %2428 = vmatmul.mubr.msk.bf16.gmra.mrb[68].mxu1 %vm414_vm2, %v2684_v25 }
 0x3f5   :  { %1061 = vmatprep.mubr.bf16.mxu0 %v2538_v6  ;;  %1134 = vmatprep.mubr.bf16.mxu1 %v2538_v6 }
 0x3fc   :  { %2425 = vmatmul.mubr.msk.bf16.gmra.mrb[72].mxu0 %vm414_vm2, %v2695_v26  ;;  %2429 = vmatmul.mubr.msk.bf16.gmra.mrb[72].mxu1 %vm414_vm2, %v2695_v26 }
 0x3fd   :  { %1071 = vmatprep.mubr.bf16.mxu0 %v2538_v6  ;;  %1144 = vmatprep.mubr.bf16.mxu1 %v2538_v6 }
 0x404   :  { %2426 = vmatmul.mubr.msk.bf16.gmra.mrb[76].mxu0 %vm414_vm2, %v2706_v27  ;;  %2430 = vmatmul.mubr.msk.bf16.gmra.mrb[76].mxu1 %vm414_vm2, %v2706_v27 }
 0x405   :  { %1235 = vmatprep.mubr.bf16.mxu0 %v2538_v6  ;;  %1308 = vmatprep.mubr.bf16.mxu1 %v2538_v6 }
 0x4bf   :  { %v1043_v24 = vpop.f32.mrb[64].mxu0  ;;  %v1116_v25 = vpop.f32.mrb[64].mxu1 }
 0x4c0   :  { %v1044_v62 = vadd.f32 %v1043_v24, %v2714_v28  ;;  %v1117_v26 = vadd.f32 %v1116_v25, %v2714_v28  ;;  %v1045_v63 = vpop.f32.mrb[65].mxu0  ;;  %v1118_v0 = vpop.f32.mrb[65].mxu1 }
 0x4c1   :  { %v1046_v1 = vadd.f32 %v1045_v63, %v2714_v28  ;;  %v1119_v2 = vadd.f32 %v1118_v0, %v2714_v28  ;;  %v1047_v3 = vpop.f32.mrb[66].mxu0  ;;  %v1120_v4 = vpop.f32.mrb[66].mxu1 }
 0x4c2   :  { %v1048_v27 = vadd.f32 %v1047_v3, %v2716_v29  ;;  %v1121_v5 = vadd.f32 %v1120_v4, %v2716_v29  ;;  %v1049_v7 = vpop.f32.mrb[67].mxu0  ;;  %v1122_v8 = vpop.f32.mrb[67].mxu1  ;;  %v1155_v11 = vmax.f32 %v1044_v62, 0.0  ;;  %v1157_v12 = vmax.f32 %v1117_v26, 0.0 }
 0x4c3   :  { %v1050_v9 = vadd.f32 %v1049_v7, %v2716_v29  ;;  %v1123_v10 = vadd.f32 %v1122_v8, %v2716_v29  ;;  %v1156_v15 = vmax.f32 %v1046_v1, 0.0  ;;  %v1158_v16 = vmax.f32 %v1119_v2, 0.0 }
 0x4c4   :  { %v1159_v13 = vmax.f32 %v1048_v27, 0.0  ;;  %v1161_v14 = vmax.f32 %v1121_v5, 0.0 }
 0x4c5   :  { %v1160_v17 = vmax.f32 %v1050_v9, 0.0  ;;  %v1162_v18 = vmax.f32 %v1123_v10, 0.0 }
 0x4c6   :  { %v1187_v19 = vpack.c.bf16 %v1159_v13, %v1155_v11  ;;  %v1189_v20 = vpack.c.bf16 %v1161_v14, %v1157_v12 }
 0x4c7   :  { %v1188_v23 = vpack.c.bf16 %v1160_v17, %v1156_v15  ;;  %v1190_v30 = vpack.c.bf16 %v1162_v18, %v1158_v16  ;;  %v1053_v31 = vpop.f32.mrb[68].mxu0  ;;  %v1126_v32 = vpop.f32.mrb[68].mxu1 }
 0x4c8   :  { %v1054_v33 = vadd.f32 %v1053_v31, %v2726_v54  ;;  %v1127_v34 = vadd.f32 %v1126_v32, %v2726_v54  ;;  %v1055_v35 = vpop.f32.mrb[69].mxu0  ;;  %v1128_v36 = vpop.f32.mrb[69].mxu1 }
 0x4c9   :  { %v1056_v37 = vadd.f32 %v1055_v35, %v2726_v54  ;;  %v1129_v38 = vadd.f32 %v1128_v36, %v2726_v54  ;;  %v1057_v39 = vpop.f32.mrb[70].mxu0  ;;  %v1130_v40 = vpop.f32.mrb[70].mxu1  ;;  %1203 = vmatprep.subr.bf16.mxu0 %v1188_v23  ;;  %1276 = vmatprep.subr.bf16.mxu1 %v1190_v30 }
 0x4ca   :  { %v1058_v41 = vadd.f32 %v1057_v39, %v2728_v55  ;;  %v1131_v42 = vadd.f32 %v1130_v40, %v2728_v55  ;;  %v1059_v43 = vpop.f32.mrb[71].mxu0  ;;  %v1132_v44 = vpop.f32.mrb[71].mxu1  ;;  %1204 = vmatpush1.bf16.msra.mxu0 %v1187_v19  ;;  %1277 = vmatpush1.bf16.msra.mxu1 %v1189_v20  ;;  %v1163_v47 = vmax.f32 %v1054_v33, 0.0  ;;  %v1165_v48 = vmax.f32 %v1127_v34, 0.0 }
 0x4cb   :  { %v1060_v45 = vadd.f32 %v1059_v43, %v2728_v55  ;;  %v1133_v46 = vadd.f32 %v1132_v44, %v2728_v55  ;;  %v1164_v51 = vmax.f32 %v1056_v37, 0.0  ;;  %v1166_v52 = vmax.f32 %v1129_v38, 0.0 }
 0x4cc   :  { %v1167_v49 = vmax.f32 %v1058_v41, 0.0  ;;  %v1169_v50 = vmax.f32 %v1131_v42, 0.0 }
 0x4cd   :  { %v1168_v53 = vmax.f32 %v1060_v45, 0.0  ;;  %v1170_v56 = vmax.f32 %v1133_v46, 0.0 }
 0x4ce   :  { %v1191_v57 = vpack.c.bf16 %v1167_v49, %v1163_v47  ;;  %v1193_v58 = vpack.c.bf16 %v1169_v50, %v1165_v48 }
 0x4cf   :  { %v1192_v61 = vpack.c.bf16 %v1168_v53, %v1164_v51  ;;  %v1194_v24 = vpack.c.bf16 %v1170_v56, %v1166_v52  ;;  %v1063_v25 = vpop.f32.mrb[72].mxu0  ;;  %v1136_v62 = vpop.f32.mrb[72].mxu1 }
 0x4d0   :  { %v1064_v26 = vadd.f32 %v1063_v25, %v2738_v21  ;;  %v1137_v63 = vadd.f32 %v1136_v62, %v2738_v21  ;;  %v1065_v0 = vpop.f32.mrb[73].mxu0  ;;  %v1138_v1 = vpop.f32.mrb[73].mxu1  ;;  %v2933_v62 = vld [vmem:[%s3262_s3] sm:$0xff]  }
 0x4d1   :  { %v1066_v2 = vadd.f32 %v1065_v0, %v2738_v21  ;;  %v1139_v3 = vadd.f32 %v1138_v1, %v2738_v21  ;;  %v1067_v4 = vpop.f32.mrb[74].mxu0  ;;  %v1140_v27 = vpop.f32.mrb[74].mxu1  ;;  %1205 = vmatprep.subr.bf16.mxu0 %v1192_v61  ;;  %1278 = vmatprep.subr.bf16.mxu1 %v1194_v24  ;;  %v2966_v0 = vld [vmem:[%s3262_s3 + $0x18] sm:$0xff]  }
 0x4d2   :  { %v1068_v5 = vadd.f32 %v1067_v4, %v2740_v22  ;;  %v1141_v7 = vadd.f32 %v1140_v27, %v2740_v22  ;;  %v1069_v8 = vpop.f32.mrb[75].mxu0  ;;  %v1142_v9 = vpop.f32.mrb[75].mxu1  ;;  %1206 = vmatpush1.bf16.msra.mxu0 %v1191_v57  ;;  %1279 = vmatpush1.bf16.msra.mxu1 %v1193_v58  ;;  %v1171_v12 = vmax.f32 %v1064_v26, 0.0  ;;  %v1173_v13 = vmax.f32 %v1137_v63, 0.0  ;;  %v2944_v26 = vld [vmem:[%s3262_s3 + $0x8] sm:$0xff]   ;;  %v2955_v63 = vld [vmem:[%s3262_s3 + $0x10] sm:$0xff]  }
 0x4d3   :  { %v1070_v10 = vadd.f32 %v1069_v8, %v2740_v22  ;;  %v1143_v11 = vadd.f32 %v1142_v9, %v2740_v22  ;;  %v1172_v16 = vmax.f32 %v1066_v2, 0.0  ;;  %v1174_v17 = vmax.f32 %v1139_v3, 0.0 }
 0x4d4   :  { %v1175_v14 = vmax.f32 %v1068_v5, 0.0  ;;  %v1177_v15 = vmax.f32 %v1141_v7, 0.0 }
 0x4d5   :  { %v1176_v18 = vmax.f32 %v1070_v10, 0.0  ;;  %v1178_v19 = vmax.f32 %v1143_v11, 0.0 }
 0x4d6   :  { %v1195_v20 = vpack.c.bf16 %v1175_v14, %v1171_v12  ;;  %v1197_v23 = vpack.c.bf16 %v1177_v15, %v1173_v13 }
 0x4d7   :  { %v1196_v30 = vpack.c.bf16 %v1176_v18, %v1172_v16  ;;  %v1198_v31 = vpack.c.bf16 %v1178_v19, %v1174_v17  ;;  %v1073_v32 = vpop.f32.mrb[76].mxu0  ;;  %v1146_v33 = vpop.f32.mrb[76].mxu1 }
 0x4d8   :  { %v1074_v34 = vadd.f32 %v1073_v32, %v2750_v59  ;;  %v1147_v35 = vadd.f32 %v1146_v33, %v2750_v59  ;;  %v1075_v36 = vpop.f32.mrb[77].mxu0  ;;  %v1148_v37 = vpop.f32.mrb[77].mxu1 }
 0x4d9   :  { %v1076_v38 = vadd.f32 %v1075_v36, %v2750_v59  ;;  %v1149_v39 = vadd.f32 %v1148_v37, %v2750_v59  ;;  %v1077_v40 = vpop.f32.mrb[78].mxu0  ;;  %v1150_v41 = vpop.f32.mrb[78].mxu1  ;;  %1207 = vmatprep.subr.bf16.mxu0 %v1196_v30  ;;  %1280 = vmatprep.subr.bf16.mxu1 %v1198_v31 }
 0x4da   :  { %v1078_v42 = vadd.f32 %v1077_v40, %v2752_v60  ;;  %v1151_v43 = vadd.f32 %v1150_v41, %v2752_v60  ;;  %v1079_v44 = vpop.f32.mrb[79].mxu0  ;;  %v1152_v45 = vpop.f32.mrb[79].mxu1  ;;  %1208 = vmatpush1.bf16.msra.mxu0 %v1195_v20  ;;  %1281 = vmatpush1.bf16.msra.mxu1 %v1197_v23  ;;  %v1179_v48 = vmax.f32 %v1074_v34, 0.0  ;;  %v1181_v49 = vmax.f32 %v1147_v35, 0.0 }
 0x4db   :  { %v1080_v46 = vadd.f32 %v1079_v44, %v2752_v60  ;;  %v1153_v47 = vadd.f32 %v1152_v45, %v2752_v60  ;;  %v1180_v52 = vmax.f32 %v1076_v38, 0.0  ;;  %v1182_v53 = vmax.f32 %v1149_v39, 0.0 }
 0x4dc   :  { %v1183_v50 = vmax.f32 %v1078_v42, 0.0  ;;  %v1185_v51 = vmax.f32 %v1151_v43, 0.0 }
 0x4dd   :  { %v1184_v56 = vmax.f32 %v1080_v46, 0.0  ;;  %v1186_v57 = vmax.f32 %v1153_v47, 0.0 }
 0x4de   :  { %v1199_v58 = vpack.c.bf16 %v1183_v50, %v1179_v48  ;;  %v1201_v61 = vpack.c.bf16 %v1185_v51, %v1181_v49 }
 0x4df   :  { %v1200_v24 = vpack.c.bf16 %v1184_v56, %v1180_v52  ;;  %v1202_v25 = vpack.c.bf16 %v1186_v57, %v1182_v53 }
 0x4e1   :  { %1209 = vmatprep.subr.bf16.mxu0 %v1200_v24  ;;  %1282 = vmatprep.subr.bf16.mxu1 %v1202_v25 }
 0x4e2   :  { %1210 = vmatpush1.bf16.msra.mxu0 %v1199_v58  ;;  %1283 = vmatpush1.bf16.msra.mxu1 %v1201_v61 }
 0x4e5   :  { %2431 = vmatmul.mubr.msk.bf16.vlgmr.msra.gmra.mrb[80].mxu0 %vm414_vm2, %v2933_v62  ;;  %2435 = vmatmul.mubr.msk.bf16.vlgmr.msra.gmra.mrb[80].mxu1 %vm414_vm2, %v2933_v62 }
 0x4e6   :  { %1245 = vmatprep.mubr.bf16.mxu0 %v2538_v6  ;;  %1318 = vmatprep.mubr.bf16.mxu1 %v2538_v6 }
 0x4ed   :  { %2432 = vmatmul.mubr.msk.bf16.gmra.mrb[84].mxu0 %vm414_vm2, %v2944_v26  ;;  %2436 = vmatmul.mubr.msk.bf16.gmra.mrb[84].mxu1 %vm414_vm2, %v2944_v26 }
 0x4ee   :  { %1255 = vmatprep.mubr.bf16.mxu0 %v2538_v6  ;;  %1328 = vmatprep.mubr.bf16.mxu1 %v2538_v6 }
 0x4f5   :  { %2433 = vmatmul.mubr.msk.bf16.gmra.mrb[88].mxu0 %vm414_vm2, %v2955_v63  ;;  %2437 = vmatmul.mubr.msk.bf16.gmra.mrb[88].mxu1 %vm414_vm2, %v2955_v63 }
 0x4f6   :  { %1265 = vmatprep.mubr.bf16.mxu0 %v2538_v6  ;;  %1338 = vmatprep.mubr.bf16.mxu1 %v2538_v6 }
 0x4fd   :  { %2434 = vmatmul.mubr.msk.bf16.gmra.mrb[92].mxu0 %vm414_vm2, %v2966_v0  ;;  %2438 = vmatmul.mubr.msk.bf16.gmra.mrb[92].mxu1 %vm414_vm2, %v2966_v0 }
 0x4fe   :  { %1429 = vmatprep.mubr.bf16.mxu0 %v2538_v6  ;;  %1502 = vmatprep.mubr.bf16.mxu1 %v2538_v6 }
 0x5b8   :  { %v1237_v1 = vpop.f32.mrb[80].mxu0  ;;  %v1310_v2 = vpop.f32.mrb[80].mxu1 }
 0x5b9   :  { %v1238_v3 = vadd.f32 %v1237_v1, %v2714_v28  ;;  %v1311_v4 = vadd.f32 %v1310_v2, %v2714_v28  ;;  %v1239_v27 = vpop.f32.mrb[81].mxu0  ;;  %v1312_v5 = vpop.f32.mrb[81].mxu1 }
 0x5ba   :  { %v1240_v7 = vadd.f32 %v1239_v27, %v2714_v28  ;;  %v1313_v8 = vadd.f32 %v1312_v5, %v2714_v28  ;;  %v1241_v9 = vpop.f32.mrb[82].mxu0  ;;  %v1314_v10 = vpop.f32.mrb[82].mxu1 }
 0x5bb   :  { %v1242_v11 = vadd.f32 %v1241_v9, %v2716_v29  ;;  %v1315_v12 = vadd.f32 %v1314_v10, %v2716_v29  ;;  %v1243_v13 = vpop.f32.mrb[83].mxu0  ;;  %v1316_v14 = vpop.f32.mrb[83].mxu1  ;;  %v1349_v17 = vmax.f32 %v1238_v3, 0.0  ;;  %v1351_v18 = vmax.f32 %v1311_v4, 0.0 }
 0x5bc   :  { %v1244_v15 = vadd.f32 %v1243_v13, %v2716_v29  ;;  %v1317_v16 = vadd.f32 %v1316_v14, %v2716_v29  ;;  %v1350_v23 = vmax.f32 %v1240_v7, 0.0  ;;  %v1352_v30 = vmax.f32 %v1313_v8, 0.0 }
 0x5bd   :  { %v1353_v19 = vmax.f32 %v1242_v11, 0.0  ;;  %v1355_v20 = vmax.f32 %v1315_v12, 0.0 }
 0x5be   :  { %v1354_v31 = vmax.f32 %v1244_v15, 0.0  ;;  %v1356_v32 = vmax.f32 %v1317_v16, 0.0 }
 0x5bf   :  { %v1381_v33 = vpack.c.bf16 %v1353_v19, %v1349_v17  ;;  %v1383_v34 = vpack.c.bf16 %v1355_v20, %v1351_v18 }
 0x5c0   :  { %v1382_v35 = vpack.c.bf16 %v1354_v31, %v1350_v23  ;;  %v1384_v36 = vpack.c.bf16 %v1356_v32, %v1352_v30  ;;  %v1247_v37 = vpop.f32.mrb[84].mxu0  ;;  %v1320_v38 = vpop.f32.mrb[84].mxu1 }
 0x5c1   :  { %v1248_v39 = vadd.f32 %v1247_v37, %v2726_v54  ;;  %v1321_v40 = vadd.f32 %v1320_v38, %v2726_v54  ;;  %v1249_v41 = vpop.f32.mrb[85].mxu0  ;;  %v1322_v42 = vpop.f32.mrb[85].mxu1 }
 0x5c2   :  { %v1250_v43 = vadd.f32 %v1249_v41, %v2726_v54  ;;  %v1323_v44 = vadd.f32 %v1322_v42, %v2726_v54  ;;  %v1251_v45 = vpop.f32.mrb[86].mxu0  ;;  %v1324_v46 = vpop.f32.mrb[86].mxu1  ;;  %1397 = vmatprep.subr.bf16.mxu0 %v1382_v35  ;;  %1470 = vmatprep.subr.bf16.mxu1 %v1384_v36 }
 0x5c3   :  { %v1252_v47 = vadd.f32 %v1251_v45, %v2728_v55  ;;  %v1325_v48 = vadd.f32 %v1324_v46, %v2728_v55  ;;  %v1253_v49 = vpop.f32.mrb[87].mxu0  ;;  %v1326_v50 = vpop.f32.mrb[87].mxu1  ;;  %1398 = vmatpush1.bf16.msra.mxu0 %v1381_v33  ;;  %1471 = vmatpush1.bf16.msra.mxu1 %v1383_v34  ;;  %v1357_v53 = vmax.f32 %v1248_v39, 0.0  ;;  %v1359_v56 = vmax.f32 %v1321_v40, 0.0 }
 0x5c4   :  { %v1254_v51 = vadd.f32 %v1253_v49, %v2728_v55  ;;  %v1327_v52 = vadd.f32 %v1326_v50, %v2728_v55  ;;  %v1358_v61 = vmax.f32 %v1250_v43, 0.0  ;;  %v1360_v24 = vmax.f32 %v1323_v44, 0.0 }
 0x5c5   :  { %v1361_v57 = vmax.f32 %v1252_v47, 0.0  ;;  %v1363_v58 = vmax.f32 %v1325_v48, 0.0 }
 0x5c6   :  { %v1362_v25 = vmax.f32 %v1254_v51, 0.0  ;;  %v1364_v1 = vmax.f32 %v1327_v52, 0.0 }
 0x5c7   :  { %v1385_v2 = vpack.c.bf16 %v1361_v57, %v1357_v53  ;;  %v1387_v3 = vpack.c.bf16 %v1363_v58, %v1359_v56 }
 0x5c8   :  { %v1386_v4 = vpack.c.bf16 %v1362_v25, %v1358_v61  ;;  %v1388_v27 = vpack.c.bf16 %v1364_v1, %v1360_v24  ;;  %v1257_v5 = vpop.f32.mrb[88].mxu0  ;;  %v1330_v7 = vpop.f32.mrb[88].mxu1 }
 0x5c9   :  { %v1258_v8 = vadd.f32 %v1257_v5, %v2738_v21  ;;  %v1331_v9 = vadd.f32 %v1330_v7, %v2738_v21  ;;  %v1259_v10 = vpop.f32.mrb[89].mxu0  ;;  %v1332_v11 = vpop.f32.mrb[89].mxu1 }
 0x5ca   :  { %v1260_v12 = vadd.f32 %v1259_v10, %v2738_v21  ;;  %v1333_v13 = vadd.f32 %v1332_v11, %v2738_v21  ;;  %v1261_v14 = vpop.f32.mrb[90].mxu0  ;;  %v1334_v15 = vpop.f32.mrb[90].mxu1  ;;  %1399 = vmatprep.subr.bf16.mxu0 %v1386_v4  ;;  %1472 = vmatprep.subr.bf16.mxu1 %v1388_v27 }
 0x5cb   :  { %v1262_v16 = vadd.f32 %v1261_v14, %v2740_v22  ;;  %v1335_v17 = vadd.f32 %v1334_v15, %v2740_v22  ;;  %v1263_v18 = vpop.f32.mrb[91].mxu0  ;;  %v1336_v19 = vpop.f32.mrb[91].mxu1  ;;  %1400 = vmatpush1.bf16.msra.mxu0 %v1385_v2  ;;  %1473 = vmatpush1.bf16.msra.mxu1 %v1387_v3  ;;  %v1365_v30 = vmax.f32 %v1258_v8, 0.0  ;;  %v1367_v31 = vmax.f32 %v1331_v9, 0.0 }
 0x5cc   :  { %v1264_v20 = vadd.f32 %v1263_v18, %v2740_v22  ;;  %v1337_v23 = vadd.f32 %v1336_v19, %v2740_v22  ;;  %v1366_v34 = vmax.f32 %v1260_v12, 0.0  ;;  %v1368_v35 = vmax.f32 %v1333_v13, 0.0 }
 0x5cd   :  { %v1369_v32 = vmax.f32 %v1262_v16, 0.0  ;;  %v1371_v33 = vmax.f32 %v1335_v17, 0.0 }
 0x5ce   :  { %v1370_v36 = vmax.f32 %v1264_v20, 0.0  ;;  %v1372_v37 = vmax.f32 %v1337_v23, 0.0 }
 0x5cf   :  { %v1389_v38 = vpack.c.bf16 %v1369_v32, %v1365_v30  ;;  %v1391_v39 = vpack.c.bf16 %v1371_v33, %v1367_v31 }
 0x5d0   :  { %v1390_v40 = vpack.c.bf16 %v1370_v36, %v1366_v34  ;;  %v1392_v41 = vpack.c.bf16 %v1372_v37, %v1368_v35  ;;  %v1267_v42 = vpop.f32.mrb[92].mxu0  ;;  %v1340_v43 = vpop.f32.mrb[92].mxu1 }
 0x5d1   :  { %v1268_v44 = vadd.f32 %v1267_v42, %v2750_v59  ;;  %v1341_v45 = vadd.f32 %v1340_v43, %v2750_v59  ;;  %v1269_v46 = vpop.f32.mrb[93].mxu0  ;;  %v1342_v47 = vpop.f32.mrb[93].mxu1 }
 0x5d2   :  { %v1270_v48 = vadd.f32 %v1269_v46, %v2750_v59  ;;  %v1343_v49 = vadd.f32 %v1342_v47, %v2750_v59  ;;  %v1271_v50 = vpop.f32.mrb[94].mxu0  ;;  %v1344_v51 = vpop.f32.mrb[94].mxu1  ;;  %1401 = vmatprep.subr.bf16.mxu0 %v1390_v40  ;;  %1474 = vmatprep.subr.bf16.mxu1 %v1392_v41 }
 0x5d3   :  { %v1272_v52 = vadd.f32 %v1271_v50, %v2752_v60  ;;  %v1345_v53 = vadd.f32 %v1344_v51, %v2752_v60  ;;  %v1273_v56 = vpop.f32.mrb[95].mxu0  ;;  %v1346_v57 = vpop.f32.mrb[95].mxu1  ;;  %1402 = vmatpush1.bf16.msra.mxu0 %v1389_v38  ;;  %1475 = vmatpush1.bf16.msra.mxu1 %v1391_v39  ;;  %v1373_v24 = vmax.f32 %v1268_v44, 0.0  ;;  %v1375_v25 = vmax.f32 %v1341_v45, 0.0 }
 0x5d4   :  { %v1274_v58 = vadd.f32 %v1273_v56, %v2752_v60  ;;  %v1347_v61 = vadd.f32 %v1346_v57, %v2752_v60  ;;  %v1374_v3 = vmax.f32 %v1270_v48, 0.0  ;;  %v1376_v4 = vmax.f32 %v1343_v49, 0.0 }
 0x5d5   :  { %v1377_v1 = vmax.f32 %v1272_v52, 0.0  ;;  %v1379_v2 = vmax.f32 %v1345_v53, 0.0 }
 0x5d6   :  { %v1378_v27 = vmax.f32 %v1274_v58, 0.0  ;;  %v1380_v5 = vmax.f32 %v1347_v61, 0.0 }
 0x5d7   :  { %v1393_v7 = vpack.c.bf16 %v1377_v1, %v1373_v24  ;;  %v1395_v8 = vpack.c.bf16 %v1379_v2, %v1375_v25 }
 0x5d8   :  { %v1394_v9 = vpack.c.bf16 %v1378_v27, %v1374_v3  ;;  %v1396_v10 = vpack.c.bf16 %v1380_v5, %v1376_v4 }
 0x5da   :  { %1403 = vmatprep.subr.bf16.mxu0 %v1394_v9  ;;  %1476 = vmatprep.subr.bf16.mxu1 %v1396_v10 }
 0x5db   :  { %1404 = vmatpush1.bf16.msra.mxu0 %v1393_v7  ;;  %1477 = vmatpush1.bf16.msra.mxu1 %v1395_v8 }
 0x5de   :  { %2439 = vmatmul.mubr.msk.bf16.vlgmr.msra.gmra.mrb[96].mxu0 %vm414_vm2, %v2933_v62  ;;  %2443 = vmatmul.mubr.msk.bf16.vlgmr.msra.gmra.mrb[96].mxu1 %vm414_vm2, %v2933_v62 }
 0x5df   :  { %1439 = vmatprep.mubr.bf16.mxu0 %v2538_v6  ;;  %1512 = vmatprep.mubr.bf16.mxu1 %v2538_v6 }
 0x5e6   :  { %2440 = vmatmul.mubr.msk.bf16.gmra.mrb[100].mxu0 %vm414_vm2, %v2944_v26  ;;  %2444 = vmatmul.mubr.msk.bf16.gmra.mrb[100].mxu1 %vm414_vm2, %v2944_v26 }
 0x5e7   :  { %1449 = vmatprep.mubr.bf16.mxu0 %v2538_v6  ;;  %1522 = vmatprep.mubr.bf16.mxu1 %v2538_v6 }
 0x5ee   :  { %2441 = vmatmul.mubr.msk.bf16.gmra.mrb[104].mxu0 %vm414_vm2, %v2955_v63  ;;  %2445 = vmatmul.mubr.msk.bf16.gmra.mrb[104].mxu1 %vm414_vm2, %v2955_v63 }
 0x5ef   :  { %1459 = vmatprep.mubr.bf16.mxu0 %v2538_v6  ;;  %1532 = vmatprep.mubr.bf16.mxu1 %v2538_v6 }
 0x5f6   :  { %2442 = vmatmul.mubr.msk.bf16.gmra.mrb[108].mxu0 %vm414_vm2, %v2966_v0  ;;  %2446 = vmatmul.mubr.msk.bf16.gmra.mrb[108].mxu1 %vm414_vm2, %v2966_v0 }
 0x5f7   :  { %1623 = vmatprep.mubr.bf16.mxu0 %v2538_v6  ;;  %1696 = vmatprep.mubr.bf16.mxu1 %v2538_v6 }
 0x6b1   :  { %v1431_v11 = vpop.f32.mrb[96].mxu0  ;;  %v1504_v12 = vpop.f32.mrb[96].mxu1 }
 0x6b2   :  { %v1432_v13 = vadd.f32 %v1431_v11, %v2714_v28  ;;  %v1505_v14 = vadd.f32 %v1504_v12, %v2714_v28  ;;  %v1433_v15 = vpop.f32.mrb[97].mxu0  ;;  %v1506_v16 = vpop.f32.mrb[97].mxu1 }
 0x6b3   :  { %v1434_v17 = vadd.f32 %v1433_v15, %v2714_v28  ;;  %v1507_v18 = vadd.f32 %v1506_v16, %v2714_v28  ;;  %v1435_v19 = vpop.f32.mrb[98].mxu0  ;;  %v1508_v20 = vpop.f32.mrb[98].mxu1 }
 0x6b4   :  { %v1436_v23 = vadd.f32 %v1435_v19, %v2716_v29  ;;  %v1509_v30 = vadd.f32 %v1508_v20, %v2716_v29  ;;  %v1437_v31 = vpop.f32.mrb[99].mxu0  ;;  %v1510_v32 = vpop.f32.mrb[99].mxu1  ;;  %v1543_v35 = vmax.f32 %v1432_v13, 0.0  ;;  %v1545_v36 = vmax.f32 %v1505_v14, 0.0 }
 0x6b5   :  { %v1438_v33 = vadd.f32 %v1437_v31, %v2716_v29  ;;  %v1511_v34 = vadd.f32 %v1510_v32, %v2716_v29  ;;  %v1544_v39 = vmax.f32 %v1434_v17, 0.0  ;;  %v1546_v40 = vmax.f32 %v1507_v18, 0.0 }
 0x6b6   :  { %v1547_v37 = vmax.f32 %v1436_v23, 0.0  ;;  %v1549_v38 = vmax.f32 %v1509_v30, 0.0 }
 0x6b7   :  { %v1548_v41 = vmax.f32 %v1438_v33, 0.0  ;;  %v1550_v42 = vmax.f32 %v1511_v34, 0.0 }
 0x6b8   :  { %v1575_v43 = vpack.c.bf16 %v1547_v37, %v1543_v35  ;;  %v1577_v44 = vpack.c.bf16 %v1549_v38, %v1545_v36 }
 0x6b9   :  { %v1576_v45 = vpack.c.bf16 %v1548_v41, %v1544_v39  ;;  %v1578_v46 = vpack.c.bf16 %v1550_v42, %v1546_v40  ;;  %v1441_v47 = vpop.f32.mrb[100].mxu0  ;;  %v1514_v48 = vpop.f32.mrb[100].mxu1 }
 0x6ba   :  { %v1442_v49 = vadd.f32 %v1441_v47, %v2726_v54  ;;  %v1515_v50 = vadd.f32 %v1514_v48, %v2726_v54  ;;  %v1443_v51 = vpop.f32.mrb[101].mxu0  ;;  %v1516_v52 = vpop.f32.mrb[101].mxu1 }
 0x6bb   :  { %v1444_v53 = vadd.f32 %v1443_v51, %v2726_v54  ;;  %v1517_v56 = vadd.f32 %v1516_v52, %v2726_v54  ;;  %v1445_v57 = vpop.f32.mrb[102].mxu0  ;;  %v1518_v58 = vpop.f32.mrb[102].mxu1  ;;  %1591 = vmatprep.subr.bf16.mxu0 %v1576_v45  ;;  %1664 = vmatprep.subr.bf16.mxu1 %v1578_v46 }
 0x6bc   :  { %v1446_v61 = vadd.f32 %v1445_v57, %v2728_v55  ;;  %v1519_v24 = vadd.f32 %v1518_v58, %v2728_v55  ;;  %v1447_v25 = vpop.f32.mrb[103].mxu0  ;;  %v1520_v1 = vpop.f32.mrb[103].mxu1  ;;  %1592 = vmatpush1.bf16.msra.mxu0 %v1575_v43  ;;  %1665 = vmatpush1.bf16.msra.mxu1 %v1577_v44  ;;  %v1551_v4 = vmax.f32 %v1442_v49, 0.0  ;;  %v1553_v27 = vmax.f32 %v1515_v50, 0.0 }
 0x6bd   :  { %v1448_v2 = vadd.f32 %v1447_v25, %v2728_v55  ;;  %v1521_v3 = vadd.f32 %v1520_v1, %v2728_v55  ;;  %v1552_v8 = vmax.f32 %v1444_v53, 0.0  ;;  %v1554_v9 = vmax.f32 %v1517_v56, 0.0 }
 0x6be   :  { %v1555_v5 = vmax.f32 %v1446_v61, 0.0  ;;  %v1557_v7 = vmax.f32 %v1519_v24, 0.0 }
 0x6bf   :  { %v1556_v10 = vmax.f32 %v1448_v2, 0.0  ;;  %v1558_v11 = vmax.f32 %v1521_v3, 0.0 }
 0x6c0   :  { %v1579_v12 = vpack.c.bf16 %v1555_v5, %v1551_v4  ;;  %v1581_v13 = vpack.c.bf16 %v1557_v7, %v1553_v27 }
 0x6c1   :  { %v1580_v14 = vpack.c.bf16 %v1556_v10, %v1552_v8  ;;  %v1582_v15 = vpack.c.bf16 %v1558_v11, %v1554_v9  ;;  %v1451_v16 = vpop.f32.mrb[104].mxu0  ;;  %v1524_v17 = vpop.f32.mrb[104].mxu1 }
 0x6c2   :  { %v1452_v18 = vadd.f32 %v1451_v16, %v2738_v21  ;;  %v1525_v19 = vadd.f32 %v1524_v17, %v2738_v21  ;;  %v1453_v20 = vpop.f32.mrb[105].mxu0  ;;  %v1526_v23 = vpop.f32.mrb[105].mxu1 }
 0x6c3   :  { %v1454_v30 = vadd.f32 %v1453_v20, %v2738_v21  ;;  %v1527_v31 = vadd.f32 %v1526_v23, %v2738_v21  ;;  %v1455_v32 = vpop.f32.mrb[106].mxu0  ;;  %v1528_v33 = vpop.f32.mrb[106].mxu1  ;;  %1593 = vmatprep.subr.bf16.mxu0 %v1580_v14  ;;  %1666 = vmatprep.subr.bf16.mxu1 %v1582_v15 }
 0x6c4   :  { %v1456_v34 = vadd.f32 %v1455_v32, %v2740_v22  ;;  %v1529_v35 = vadd.f32 %v1528_v33, %v2740_v22  ;;  %v1457_v36 = vpop.f32.mrb[107].mxu0  ;;  %v1530_v37 = vpop.f32.mrb[107].mxu1  ;;  %1594 = vmatpush1.bf16.msra.mxu0 %v1579_v12  ;;  %1667 = vmatpush1.bf16.msra.mxu1 %v1581_v13  ;;  %v1559_v40 = vmax.f32 %v1452_v18, 0.0  ;;  %v1561_v41 = vmax.f32 %v1525_v19, 0.0 }
 0x6c5   :  { %v1458_v38 = vadd.f32 %v1457_v36, %v2740_v22  ;;  %v1531_v39 = vadd.f32 %v1530_v37, %v2740_v22  ;;  %v1560_v44 = vmax.f32 %v1454_v30, 0.0  ;;  %v1562_v45 = vmax.f32 %v1527_v31, 0.0 }
 0x6c6   :  { %v1563_v42 = vmax.f32 %v1456_v34, 0.0  ;;  %v1565_v43 = vmax.f32 %v1529_v35, 0.0 }
 0x6c7   :  { %v1564_v46 = vmax.f32 %v1458_v38, 0.0  ;;  %v1566_v47 = vmax.f32 %v1531_v39, 0.0 }
 0x6c8   :  { %v1583_v48 = vpack.c.bf16 %v1563_v42, %v1559_v40  ;;  %v1585_v49 = vpack.c.bf16 %v1565_v43, %v1561_v41 }
 0x6c9   :  { %v1584_v50 = vpack.c.bf16 %v1564_v46, %v1560_v44  ;;  %v1586_v51 = vpack.c.bf16 %v1566_v47, %v1562_v45  ;;  %v1461_v52 = vpop.f32.mrb[108].mxu0  ;;  %v1534_v53 = vpop.f32.mrb[108].mxu1 }
 0x6ca   :  { %v1462_v56 = vadd.f32 %v1461_v52, %v2750_v59  ;;  %v1535_v57 = vadd.f32 %v1534_v53, %v2750_v59  ;;  %v1463_v58 = vpop.f32.mrb[109].mxu0  ;;  %v1536_v61 = vpop.f32.mrb[109].mxu1 }
 0x6cb   :  { %v1464_v24 = vadd.f32 %v1463_v58, %v2750_v59  ;;  %v1537_v25 = vadd.f32 %v1536_v61, %v2750_v59  ;;  %v1465_v1 = vpop.f32.mrb[110].mxu0  ;;  %v1538_v2 = vpop.f32.mrb[110].mxu1  ;;  %1595 = vmatprep.subr.bf16.mxu0 %v1584_v50  ;;  %1668 = vmatprep.subr.bf16.mxu1 %v1586_v51 }
 0x6cc   :  { %v1466_v3 = vadd.f32 %v1465_v1, %v2752_v60  ;;  %v1539_v4 = vadd.f32 %v1538_v2, %v2752_v60  ;;  %v1467_v27 = vpop.f32.mrb[111].mxu0  ;;  %v1540_v5 = vpop.f32.mrb[111].mxu1  ;;  %1596 = vmatpush1.bf16.msra.mxu0 %v1583_v48  ;;  %1669 = vmatpush1.bf16.msra.mxu1 %v1585_v49  ;;  %v1567_v9 = vmax.f32 %v1462_v56, 0.0  ;;  %v1569_v10 = vmax.f32 %v1535_v57, 0.0 }
 0x6cd   :  { %v1468_v7 = vadd.f32 %v1467_v27, %v2752_v60  ;;  %v1541_v8 = vadd.f32 %v1540_v5, %v2752_v60  ;;  %v1568_v13 = vmax.f32 %v1464_v24, 0.0  ;;  %v1570_v14 = vmax.f32 %v1537_v25, 0.0 }
 0x6ce   :  { %v1571_v11 = vmax.f32 %v1466_v3, 0.0  ;;  %v1573_v12 = vmax.f32 %v1539_v4, 0.0 }
 0x6cf   :  { %v1572_v15 = vmax.f32 %v1468_v7, 0.0  ;;  %v1574_v16 = vmax.f32 %v1541_v8, 0.0 }
 0x6d0   :  { %v1587_v17 = vpack.c.bf16 %v1571_v11, %v1567_v9  ;;  %v1589_v18 = vpack.c.bf16 %v1573_v12, %v1569_v10 }
 0x6d1   :  { %v1588_v19 = vpack.c.bf16 %v1572_v15, %v1568_v13  ;;  %v1590_v20 = vpack.c.bf16 %v1574_v16, %v1570_v14 }
 0x6d3   :  { %1597 = vmatprep.subr.bf16.mxu0 %v1588_v19  ;;  %1670 = vmatprep.subr.bf16.mxu1 %v1590_v20 }
 0x6d4   :  { %1598 = vmatpush1.bf16.msra.mxu0 %v1587_v17  ;;  %1671 = vmatpush1.bf16.msra.mxu1 %v1589_v18 }
 0x6d7   :  { %2447 = vmatmul.mubr.msk.bf16.vlgmr.msra.gmra.mrb[112].mxu0 %vm414_vm2, %v2933_v62  ;;  %2451 = vmatmul.mubr.msk.bf16.vlgmr.msra.gmra.mrb[112].mxu1 %vm414_vm2, %v2933_v62 }
 0x6d8   :  { %1633 = vmatprep.mubr.bf16.mxu0 %v2538_v6  ;;  %1706 = vmatprep.mubr.bf16.mxu1 %v2538_v6 }
 0x6df   :  { %2448 = vmatmul.mubr.msk.bf16.gmra.mrb[116].mxu0 %vm414_vm2, %v2944_v26  ;;  %2452 = vmatmul.mubr.msk.bf16.gmra.mrb[116].mxu1 %vm414_vm2, %v2944_v26 }
 0x6e0   :  { %1643 = vmatprep.mubr.bf16.mxu0 %v2538_v6  ;;  %1716 = vmatprep.mubr.bf16.mxu1 %v2538_v6 }
 0x6e7   :  { %2449 = vmatmul.mubr.msk.bf16.gmra.mrb[120].mxu0 %vm414_vm2, %v2955_v63  ;;  %2453 = vmatmul.mubr.msk.bf16.gmra.mrb[120].mxu1 %vm414_vm2, %v2955_v63 }
 0x6e8   :  { %1653 = vmatprep.mubr.bf16.mxu0 %v2538_v6  ;;  %1726 = vmatprep.mubr.bf16.mxu1 %v2538_v6 }
 0x6ef   :  { %2450 = vmatmul.mubr.msk.bf16.gmra.mrb[124].mxu0 %vm414_vm2, %v2966_v0  ;;  %2454 = vmatmul.mubr.msk.bf16.gmra.mrb[124].mxu1 %vm414_vm2, %v2966_v0 }
 0x6f0   :  { %1817 = vmatprep.mubr.bf16.mxu0 %v2538_v6  ;;  %1890 = vmatprep.mubr.bf16.mxu1 %v2538_v6 }
 0x7aa   :  { %v1625_v23 = vpop.f32.mrb[112].mxu0  ;;  %v1698_v30 = vpop.f32.mrb[112].mxu1 }
 0x7ab   :  { %v1626_v31 = vadd.f32 %v1625_v23, %v2714_v28  ;;  %v1699_v32 = vadd.f32 %v1698_v30, %v2714_v28  ;;  %v1627_v33 = vpop.f32.mrb[113].mxu0  ;;  %v1700_v34 = vpop.f32.mrb[113].mxu1 }
 0x7ac   :  { %v1628_v35 = vadd.f32 %v1627_v33, %v2714_v28  ;;  %v1701_v36 = vadd.f32 %v1700_v34, %v2714_v28  ;;  %v1629_v37 = vpop.f32.mrb[114].mxu0  ;;  %v1702_v38 = vpop.f32.mrb[114].mxu1 }
 0x7ad   :  { %v1630_v39 = vadd.f32 %v1629_v37, %v2716_v29  ;;  %v1703_v40 = vadd.f32 %v1702_v38, %v2716_v29  ;;  %v1631_v41 = vpop.f32.mrb[115].mxu0  ;;  %v1704_v42 = vpop.f32.mrb[115].mxu1  ;;  %v1737_v45 = vmax.f32 %v1626_v31, 0.0  ;;  %v1739_v46 = vmax.f32 %v1699_v32, 0.0 }
 0x7ae   :  { %v1632_v43 = vadd.f32 %v1631_v41, %v2716_v29  ;;  %v1705_v44 = vadd.f32 %v1704_v42, %v2716_v29  ;;  %v1738_v49 = vmax.f32 %v1628_v35, 0.0  ;;  %v1740_v50 = vmax.f32 %v1701_v36, 0.0 }
 0x7af   :  { %v1741_v47 = vmax.f32 %v1630_v39, 0.0  ;;  %v1743_v48 = vmax.f32 %v1703_v40, 0.0 }
 0x7b0   :  { %v1742_v51 = vmax.f32 %v1632_v43, 0.0  ;;  %v1744_v52 = vmax.f32 %v1705_v44, 0.0 }
 0x7b1   :  { %v1769_v53 = vpack.c.bf16 %v1741_v47, %v1737_v45  ;;  %v1771_v56 = vpack.c.bf16 %v1743_v48, %v1739_v46 }
 0x7b2   :  { %v1770_v57 = vpack.c.bf16 %v1742_v51, %v1738_v49  ;;  %v1772_v58 = vpack.c.bf16 %v1744_v52, %v1740_v50  ;;  %v1635_v61 = vpop.f32.mrb[116].mxu0  ;;  %v1708_v24 = vpop.f32.mrb[116].mxu1 }
 0x7b3   :  { %v1636_v25 = vadd.f32 %v1635_v61, %v2726_v54  ;;  %v1709_v1 = vadd.f32 %v1708_v24, %v2726_v54  ;;  %v1637_v2 = vpop.f32.mrb[117].mxu0  ;;  %v1710_v3 = vpop.f32.mrb[117].mxu1 }
 0x7b4   :  { %v1638_v4 = vadd.f32 %v1637_v2, %v2726_v54  ;;  %v1711_v27 = vadd.f32 %v1710_v3, %v2726_v54  ;;  %v1639_v5 = vpop.f32.mrb[118].mxu0  ;;  %v1712_v7 = vpop.f32.mrb[118].mxu1  ;;  %1785 = vmatprep.subr.bf16.mxu0 %v1770_v57  ;;  %1858 = vmatprep.subr.bf16.mxu1 %v1772_v58 }
 0x7b5   :  { %v1640_v8 = vadd.f32 %v1639_v5, %v2728_v55  ;;  %v1713_v9 = vadd.f32 %v1712_v7, %v2728_v55  ;;  %v1641_v10 = vpop.f32.mrb[119].mxu0  ;;  %v1714_v11 = vpop.f32.mrb[119].mxu1  ;;  %1786 = vmatpush1.bf16.msra.mxu0 %v1769_v53  ;;  %1859 = vmatpush1.bf16.msra.mxu1 %v1771_v56  ;;  %v1745_v14 = vmax.f32 %v1636_v25, 0.0  ;;  %v1747_v15 = vmax.f32 %v1709_v1, 0.0 }
 0x7b6   :  { %v1642_v12 = vadd.f32 %v1641_v10, %v2728_v55  ;;  %v1715_v13 = vadd.f32 %v1714_v11, %v2728_v55  ;;  %v1746_v18 = vmax.f32 %v1638_v4, 0.0  ;;  %v1748_v19 = vmax.f32 %v1711_v27, 0.0 }
 0x7b7   :  { %v1749_v16 = vmax.f32 %v1640_v8, 0.0  ;;  %v1751_v17 = vmax.f32 %v1713_v9, 0.0 }
 0x7b8   :  { %v1750_v20 = vmax.f32 %v1642_v12, 0.0  ;;  %v1752_v23 = vmax.f32 %v1715_v13, 0.0 }
 0x7b9   :  { %v1773_v30 = vpack.c.bf16 %v1749_v16, %v1745_v14  ;;  %v1775_v31 = vpack.c.bf16 %v1751_v17, %v1747_v15 }
 0x7ba   :  { %v1774_v32 = vpack.c.bf16 %v1750_v20, %v1746_v18  ;;  %v1776_v33 = vpack.c.bf16 %v1752_v23, %v1748_v19  ;;  %v1645_v34 = vpop.f32.mrb[120].mxu0  ;;  %v1718_v35 = vpop.f32.mrb[120].mxu1 }
 0x7bb   :  { %v1646_v36 = vadd.f32 %v1645_v34, %v2738_v21  ;;  %v1719_v37 = vadd.f32 %v1718_v35, %v2738_v21  ;;  %v1647_v38 = vpop.f32.mrb[121].mxu0  ;;  %v1720_v39 = vpop.f32.mrb[121].mxu1 }
 0x7bc   :  { %v1648_v40 = vadd.f32 %v1647_v38, %v2738_v21  ;;  %v1721_v41 = vadd.f32 %v1720_v39, %v2738_v21  ;;  %v1649_v42 = vpop.f32.mrb[122].mxu0  ;;  %v1722_v43 = vpop.f32.mrb[122].mxu1  ;;  %1787 = vmatprep.subr.bf16.mxu0 %v1774_v32  ;;  %1860 = vmatprep.subr.bf16.mxu1 %v1776_v33 }
 0x7bd   :  { %v1650_v44 = vadd.f32 %v1649_v42, %v2740_v22  ;;  %v1723_v45 = vadd.f32 %v1722_v43, %v2740_v22  ;;  %v1651_v46 = vpop.f32.mrb[123].mxu0  ;;  %v1724_v47 = vpop.f32.mrb[123].mxu1  ;;  %1788 = vmatpush1.bf16.msra.mxu0 %v1773_v30  ;;  %1861 = vmatpush1.bf16.msra.mxu1 %v1775_v31  ;;  %v1753_v50 = vmax.f32 %v1646_v36, 0.0  ;;  %v1755_v51 = vmax.f32 %v1719_v37, 0.0 }
 0x7be   :  { %v1652_v48 = vadd.f32 %v1651_v46, %v2740_v22  ;;  %v1725_v49 = vadd.f32 %v1724_v47, %v2740_v22  ;;  %v1754_v56 = vmax.f32 %v1648_v40, 0.0  ;;  %v1756_v57 = vmax.f32 %v1721_v41, 0.0 }
 0x7bf   :  { %v1757_v52 = vmax.f32 %v1650_v44, 0.0  ;;  %v1759_v53 = vmax.f32 %v1723_v45, 0.0 }
 0x7c0   :  { %v1758_v58 = vmax.f32 %v1652_v48, 0.0  ;;  %v1760_v61 = vmax.f32 %v1725_v49, 0.0 }
 0x7c1   :  { %v1777_v24 = vpack.c.bf16 %v1757_v52, %v1753_v50  ;;  %v1779_v25 = vpack.c.bf16 %v1759_v53, %v1755_v51 }
 0x7c2   :  { %v1778_v1 = vpack.c.bf16 %v1758_v58, %v1754_v56  ;;  %v1780_v2 = vpack.c.bf16 %v1760_v61, %v1756_v57  ;;  %v1655_v3 = vpop.f32.mrb[124].mxu0  ;;  %v1728_v4 = vpop.f32.mrb[124].mxu1 }
 0x7c3   :  { %v1656_v27 = vadd.f32 %v1655_v3, %v2750_v59  ;;  %v1729_v5 = vadd.f32 %v1728_v4, %v2750_v59  ;;  %v1657_v7 = vpop.f32.mrb[125].mxu0  ;;  %v1730_v8 = vpop.f32.mrb[125].mxu1 }
 0x7c4   :  { %v1658_v9 = vadd.f32 %v1657_v7, %v2750_v59  ;;  %v1731_v10 = vadd.f32 %v1730_v8, %v2750_v59  ;;  %v1659_v11 = vpop.f32.mrb[126].mxu0  ;;  %v1732_v12 = vpop.f32.mrb[126].mxu1  ;;  %1789 = vmatprep.subr.bf16.mxu0 %v1778_v1  ;;  %1862 = vmatprep.subr.bf16.mxu1 %v1780_v2 }
 0x7c5   :  { %v1660_v13 = vadd.f32 %v1659_v11, %v2752_v60  ;;  %v1733_v14 = vadd.f32 %v1732_v12, %v2752_v60  ;;  %v1661_v15 = vpop.f32.mrb[127].mxu0  ;;  %v1734_v16 = vpop.f32.mrb[127].mxu1  ;;  %1790 = vmatpush1.bf16.msra.mxu0 %v1777_v24  ;;  %1863 = vmatpush1.bf16.msra.mxu1 %v1779_v25  ;;  %v1761_v19 = vmax.f32 %v1656_v27, 0.0  ;;  %v1763_v20 = vmax.f32 %v1729_v5, 0.0 }
 0x7c6   :  { %v1662_v17 = vadd.f32 %v1661_v15, %v2752_v60  ;;  %v1735_v18 = vadd.f32 %v1734_v16, %v2752_v60  ;;  %v1762_v31 = vmax.f32 %v1658_v9, 0.0  ;;  %v1764_v32 = vmax.f32 %v1731_v10, 0.0 }
 0x7c7   :  { %v1765_v23 = vmax.f32 %v1660_v13, 0.0  ;;  %v1767_v30 = vmax.f32 %v1733_v14, 0.0 }
 0x7c8   :  { %v1766_v33 = vmax.f32 %v1662_v17, 0.0  ;;  %v1768_v34 = vmax.f32 %v1735_v18, 0.0 }
 0x7c9   :  { %v1781_v35 = vpack.c.bf16 %v1765_v23, %v1761_v19  ;;  %v1783_v36 = vpack.c.bf16 %v1767_v30, %v1763_v20 }
 0x7ca   :  { %v1782_v37 = vpack.c.bf16 %v1766_v33, %v1762_v31  ;;  %v1784_v38 = vpack.c.bf16 %v1768_v34, %v1764_v32 }
 0x7cc   :  { %1791 = vmatprep.subr.bf16.mxu0 %v1782_v37  ;;  %1864 = vmatprep.subr.bf16.mxu1 %v1784_v38 }
 0x7cd   :  { %1792 = vmatpush1.bf16.msra.mxu0 %v1781_v35  ;;  %1865 = vmatpush1.bf16.msra.mxu1 %v1783_v36 }
 0x7d0   :  { %2455 = vmatmul.mubr.msk.bf16.vlgmr.msra.gmra.mrb[128].mxu0 %vm414_vm2, %v2933_v62  ;;  %2459 = vmatmul.mubr.msk.bf16.vlgmr.msra.gmra.mrb[128].mxu1 %vm414_vm2, %v2933_v62 }
 0x7d1   :  { %1827 = vmatprep.mubr.bf16.mxu0 %v2538_v6  ;;  %1900 = vmatprep.mubr.bf16.mxu1 %v2538_v6 }
 0x7d8   :  { %2456 = vmatmul.mubr.msk.bf16.gmra.mrb[132].mxu0 %vm414_vm2, %v2944_v26  ;;  %2460 = vmatmul.mubr.msk.bf16.gmra.mrb[132].mxu1 %vm414_vm2, %v2944_v26 }
 0x7d9   :  { %1837 = vmatprep.mubr.bf16.mxu0 %v2538_v6  ;;  %1910 = vmatprep.mubr.bf16.mxu1 %v2538_v6 }
 0x7e0   :  { %2457 = vmatmul.mubr.msk.bf16.gmra.mrb[136].mxu0 %vm414_vm2, %v2955_v63  ;;  %2461 = vmatmul.mubr.msk.bf16.gmra.mrb[136].mxu1 %vm414_vm2, %v2955_v63 }
 0x7e1   :  { %1847 = vmatprep.mubr.bf16.mxu0 %v2538_v6  ;;  %1920 = vmatprep.mubr.bf16.mxu1 %v2538_v6 }
 0x7e8   :  { %2458 = vmatmul.mubr.msk.bf16.gmra.mrb[140].mxu0 %vm414_vm2, %v2966_v0  ;;  %2462 = vmatmul.mubr.msk.bf16.gmra.mrb[140].mxu1 %vm414_vm2, %v2966_v0 }
 0x7e9   :  { %2011 = vmatprep.mubr.bf16.mxu0 %v2538_v6  ;;  %2084 = vmatprep.mubr.bf16.mxu1 %v2538_v6 }
 0x8a3   :  { %v1819_v62 = vpop.f32.mrb[128].mxu0  ;;  %v1892_v26 = vpop.f32.mrb[128].mxu1 }
 0x8a4   :  { %v1820_v39 = vadd.f32 %v1819_v62, %v2714_v28  ;;  %v1893_v63 = vadd.f32 %v1892_v26, %v2714_v28  ;;  %v1821_v40 = vpop.f32.mrb[129].mxu0  ;;  %v1894_v41 = vpop.f32.mrb[129].mxu1 }
 0x8a5   :  { %v1822_v42 = vadd.f32 %v1821_v40, %v2714_v28  ;;  %v1895_v43 = vadd.f32 %v1894_v41, %v2714_v28  ;;  %v1823_v44 = vpop.f32.mrb[130].mxu0  ;;  %v1896_v45 = vpop.f32.mrb[130].mxu1 }
 0x8a6   :  { %v1824_v0 = vadd.f32 %v1823_v44, %v2716_v29  ;;  %v1897_v46 = vadd.f32 %v1896_v45, %v2716_v29  ;;  %v1825_v47 = vpop.f32.mrb[131].mxu0  ;;  %v1898_v48 = vpop.f32.mrb[131].mxu1  ;;  %v1931_v51 = vmax.f32 %v1820_v39, 0.0  ;;  %v1933_v52 = vmax.f32 %v1893_v63, 0.0 }
 0x8a7   :  { %v1826_v49 = vadd.f32 %v1825_v47, %v2716_v29  ;;  %v1899_v50 = vadd.f32 %v1898_v48, %v2716_v29  ;;  %v1932_v57 = vmax.f32 %v1822_v42, 0.0  ;;  %v1934_v58 = vmax.f32 %v1895_v43, 0.0 }
 0x8a8   :  { %v1935_v53 = vmax.f32 %v1824_v0, 0.0  ;;  %v1937_v56 = vmax.f32 %v1897_v46, 0.0 }
 0x8a9   :  { %v1936_v61 = vmax.f32 %v1826_v49, 0.0  ;;  %v1938_v24 = vmax.f32 %v1899_v50, 0.0 }
 0x8aa   :  { %v1963_v25 = vpack.c.bf16 %v1935_v53, %v1931_v51  ;;  %v1965_v1 = vpack.c.bf16 %v1937_v56, %v1933_v52 }
 0x8ab   :  { %v1964_v2 = vpack.c.bf16 %v1936_v61, %v1932_v57  ;;  %v1966_v3 = vpack.c.bf16 %v1938_v24, %v1934_v58  ;;  %v1829_v4 = vpop.f32.mrb[132].mxu0  ;;  %v1902_v27 = vpop.f32.mrb[132].mxu1 }
 0x8ac   :  { %v1830_v5 = vadd.f32 %v1829_v4, %v2726_v54  ;;  %v1903_v7 = vadd.f32 %v1902_v27, %v2726_v54  ;;  %v1831_v8 = vpop.f32.mrb[133].mxu0  ;;  %v1904_v9 = vpop.f32.mrb[133].mxu1 }
 0x8ad   :  { %v1832_v10 = vadd.f32 %v1831_v8, %v2726_v54  ;;  %v1905_v11 = vadd.f32 %v1904_v9, %v2726_v54  ;;  %v1833_v12 = vpop.f32.mrb[134].mxu0  ;;  %v1906_v13 = vpop.f32.mrb[134].mxu1  ;;  %1979 = vmatprep.subr.bf16.mxu0 %v1964_v2  ;;  %2052 = vmatprep.subr.bf16.mxu1 %v1966_v3 }
 0x8ae   :  { %v1834_v14 = vadd.f32 %v1833_v12, %v2728_v55  ;;  %v1907_v15 = vadd.f32 %v1906_v13, %v2728_v55  ;;  %v1835_v16 = vpop.f32.mrb[135].mxu0  ;;  %v1908_v17 = vpop.f32.mrb[135].mxu1  ;;  %1980 = vmatpush1.bf16.msra.mxu0 %v1963_v25  ;;  %2053 = vmatpush1.bf16.msra.mxu1 %v1965_v1  ;;  %v1939_v20 = vmax.f32 %v1830_v5, 0.0  ;;  %v1941_v23 = vmax.f32 %v1903_v7, 0.0 }
 0x8af   :  { %v1836_v18 = vadd.f32 %v1835_v16, %v2728_v55  ;;  %v1909_v19 = vadd.f32 %v1908_v17, %v2728_v55  ;;  %v1940_v32 = vmax.f32 %v1832_v10, 0.0  ;;  %v1942_v33 = vmax.f32 %v1905_v11, 0.0 }
 0x8b0   :  { %v1943_v30 = vmax.f32 %v1834_v14, 0.0  ;;  %v1945_v31 = vmax.f32 %v1907_v15, 0.0 }
 0x8b1   :  { %v1944_v34 = vmax.f32 %v1836_v18, 0.0  ;;  %v1946_v35 = vmax.f32 %v1909_v19, 0.0 }
 0x8b2   :  { %v1967_v36 = vpack.c.bf16 %v1943_v30, %v1939_v20  ;;  %v1969_v37 = vpack.c.bf16 %v1945_v31, %v1941_v23 }
 0x8b3   :  { %v1968_v38 = vpack.c.bf16 %v1944_v34, %v1940_v32  ;;  %v1970_v62 = vpack.c.bf16 %v1946_v35, %v1942_v33  ;;  %v1839_v26 = vpop.f32.mrb[136].mxu0  ;;  %v1912_v39 = vpop.f32.mrb[136].mxu1 }
 0x8b4   :  { %v1840_v63 = vadd.f32 %v1839_v26, %v2738_v21  ;;  %v1913_v40 = vadd.f32 %v1912_v39, %v2738_v21  ;;  %v1841_v41 = vpop.f32.mrb[137].mxu0  ;;  %v1914_v42 = vpop.f32.mrb[137].mxu1  ;;  %v2510_v39 = vld [vmem:[%s3262_s3] sm:$0xff]  }
 0x8b5   :  { %v1842_v43 = vadd.f32 %v1841_v41, %v2738_v21  ;;  %v1915_v44 = vadd.f32 %v1914_v42, %v2738_v21  ;;  %v1843_v45 = vpop.f32.mrb[138].mxu0  ;;  %v1916_v0 = vpop.f32.mrb[138].mxu1  ;;  %1981 = vmatprep.subr.bf16.mxu0 %v1968_v38  ;;  %2054 = vmatprep.subr.bf16.mxu1 %v1970_v62  ;;  %v2513_v41 = vld [vmem:[%s3262_s3 + $0x18] sm:$0xff]  }
 0x8b6   :  { %v1844_v46 = vadd.f32 %v1843_v45, %v2740_v22  ;;  %v1917_v47 = vadd.f32 %v1916_v0, %v2740_v22  ;;  %v1845_v48 = vpop.f32.mrb[139].mxu0  ;;  %v1918_v49 = vpop.f32.mrb[139].mxu1  ;;  %1982 = vmatpush1.bf16.msra.mxu0 %v1967_v36  ;;  %2055 = vmatpush1.bf16.msra.mxu1 %v1969_v37  ;;  %v1947_v52 = vmax.f32 %v1840_v63, 0.0  ;;  %v1949_v53 = vmax.f32 %v1913_v40, 0.0  ;;  %v2511_v63 = vld [vmem:[%s3262_s3 + $0x8] sm:$0xff]   ;;  %v2512_v40 = vld [vmem:[%s3262_s3 + $0x10] sm:$0xff]  }
 0x8b7   :  { %v1846_v50 = vadd.f32 %v1845_v48, %v2740_v22  ;;  %v1919_v51 = vadd.f32 %v1918_v49, %v2740_v22  ;;  %v1948_v58 = vmax.f32 %v1842_v43, 0.0  ;;  %v1950_v61 = vmax.f32 %v1915_v44, 0.0 }
 0x8b8   :  { %v1951_v56 = vmax.f32 %v1844_v46, 0.0  ;;  %v1953_v57 = vmax.f32 %v1917_v47, 0.0 }
 0x8b9   :  { %v1952_v24 = vmax.f32 %v1846_v50, 0.0  ;;  %v1954_v25 = vmax.f32 %v1919_v51, 0.0 }
 0x8ba   :  { %v1971_v1 = vpack.c.bf16 %v1951_v56, %v1947_v52  ;;  %v1973_v2 = vpack.c.bf16 %v1953_v57, %v1949_v53 }
 0x8bb   :  { %v1972_v3 = vpack.c.bf16 %v1952_v24, %v1948_v58  ;;  %v1974_v4 = vpack.c.bf16 %v1954_v25, %v1950_v61  ;;  %v1849_v27 = vpop.f32.mrb[140].mxu0  ;;  %v1922_v5 = vpop.f32.mrb[140].mxu1 }
 0x8bc   :  { %v1850_v7 = vadd.f32 %v1849_v27, %v2750_v59  ;;  %v1923_v8 = vadd.f32 %v1922_v5, %v2750_v59  ;;  %v1851_v9 = vpop.f32.mrb[141].mxu0  ;;  %v1924_v10 = vpop.f32.mrb[141].mxu1 }
 0x8bd   :  { %v1852_v11 = vadd.f32 %v1851_v9, %v2750_v59  ;;  %v1925_v12 = vadd.f32 %v1924_v10, %v2750_v59  ;;  %v1853_v13 = vpop.f32.mrb[142].mxu0  ;;  %v1926_v14 = vpop.f32.mrb[142].mxu1  ;;  %1983 = vmatprep.subr.bf16.mxu0 %v1972_v3  ;;  %2056 = vmatprep.subr.bf16.mxu1 %v1974_v4 }
 0x8be   :  { %v1854_v15 = vadd.f32 %v1853_v13, %v2752_v60  ;;  %v1927_v16 = vadd.f32 %v1926_v14, %v2752_v60  ;;  %v1855_v17 = vpop.f32.mrb[143].mxu0  ;;  %v1928_v18 = vpop.f32.mrb[143].mxu1  ;;  %1984 = vmatpush1.bf16.msra.mxu0 %v1971_v1  ;;  %2057 = vmatpush1.bf16.msra.mxu1 %v1973_v2  ;;  %v1955_v23 = vmax.f32 %v1850_v7, 0.0  ;;  %v1957_v30 = vmax.f32 %v1923_v8, 0.0 }
 0x8bf   :  { %v1856_v19 = vadd.f32 %v1855_v17, %v2752_v60  ;;  %v1929_v20 = vadd.f32 %v1928_v18, %v2752_v60  ;;  %v1956_v33 = vmax.f32 %v1852_v11, 0.0  ;;  %v1958_v34 = vmax.f32 %v1925_v12, 0.0 }
 0x8c0   :  { %v1959_v31 = vmax.f32 %v1854_v15, 0.0  ;;  %v1961_v32 = vmax.f32 %v1927_v16, 0.0 }
 0x8c1   :  { %v1960_v35 = vmax.f32 %v1856_v19, 0.0  ;;  %v1962_v36 = vmax.f32 %v1929_v20, 0.0 }
 0x8c2   :  { %v1975_v37 = vpack.c.bf16 %v1959_v31, %v1955_v23  ;;  %v1977_v38 = vpack.c.bf16 %v1961_v32, %v1957_v30 }
 0x8c3   :  { %v1976_v62 = vpack.c.bf16 %v1960_v35, %v1956_v33  ;;  %v1978_v26 = vpack.c.bf16 %v1962_v36, %v1958_v34 }
 0x8c5   :  { %1985 = vmatprep.subr.bf16.mxu0 %v1976_v62  ;;  %2058 = vmatprep.subr.bf16.mxu1 %v1978_v26 }
 0x8c6   :  { %1986 = vmatpush1.bf16.msra.mxu0 %v1975_v37  ;;  %2059 = vmatpush1.bf16.msra.mxu1 %v1977_v38 }
 0x8c9   :  { %2463 = vmatmul.mubr.msk.bf16.vlgmr.msra.gmra.mrb[144].mxu0 %vm414_vm2, %v2510_v39  ;;  %2467 = vmatmul.mubr.msk.bf16.vlgmr.msra.gmra.mrb[144].mxu1 %vm414_vm2, %v2510_v39 }
 0x8ca   :  { %2021 = vmatprep.mubr.bf16.mxu0 %v2538_v6  ;;  %2094 = vmatprep.mubr.bf16.mxu1 %v2538_v6 }
 0x8d1   :  { %2464 = vmatmul.mubr.msk.bf16.gmra.mrb[148].mxu0 %vm414_vm2, %v2511_v63  ;;  %2468 = vmatmul.mubr.msk.bf16.gmra.mrb[148].mxu1 %vm414_vm2, %v2511_v63 }
 0x8d2   :  { %2031 = vmatprep.mubr.bf16.mxu0 %v2538_v6  ;;  %2104 = vmatprep.mubr.bf16.mxu1 %v2538_v6 }
 0x8d9   :  { %2465 = vmatmul.mubr.msk.bf16.gmra.mrb[152].mxu0 %vm414_vm2, %v2512_v40  ;;  %2469 = vmatmul.mubr.msk.bf16.gmra.mrb[152].mxu1 %vm414_vm2, %v2512_v40 }
 0x8da   :  { %2041 = vmatprep.mubr.bf16.mxu0 %v2538_v6  ;;  %2114 = vmatprep.mubr.bf16.mxu1 %v2538_v6 }
 0x8e1   :  { %2466 = vmatmul.mubr.msk.bf16.gmra.mrb[156].mxu0 %vm414_vm2, %v2513_v41  ;;  %2470 = vmatmul.mubr.msk.bf16.gmra.mrb[156].mxu1 %vm414_vm2, %v2513_v41 }
 0x8e2   :  { %2213 = vmatprep.mubr.bf16.mxu0 %v2538_v6  ;;  %2254 = vmatprep.mubr.bf16.mxu1 %v2538_v6 }
 0x99c   :  { %v2013_v42 = vpop.f32.mrb[144].mxu0  ;;  %v2086_v43 = vpop.f32.mrb[144].mxu1 }
 0x99d   :  { %v2014_v44 = vadd.f32 %v2013_v42, %v2714_v28  ;;  %v2087_v45 = vadd.f32 %v2086_v43, %v2714_v28  ;;  %v2015_v0 = vpop.f32.mrb[145].mxu0  ;;  %v2088_v46 = vpop.f32.mrb[145].mxu1 }
 0x99e   :  { %v2016_v47 = vadd.f32 %v2015_v0, %v2714_v28  ;;  %v2089_v48 = vadd.f32 %v2088_v46, %v2714_v28  ;;  %v2017_v49 = vpop.f32.mrb[146].mxu0  ;;  %v2090_v50 = vpop.f32.mrb[146].mxu1 }
 0x99f   :  { %v2018_v51 = vadd.f32 %v2017_v49, %v2716_v29  ;;  %v2091_v52 = vadd.f32 %v2090_v50, %v2716_v29  ;;  %v2019_v53 = vpop.f32.mrb[147].mxu0  ;;  %v2092_v6 = vpop.f32.mrb[147].mxu1  ;;  %v2125_v58 = vmax.f32 %v2014_v44, 0.0  ;;  %v2127_v61 = vmax.f32 %v2087_v45, 0.0 }
 0x9a0   :  { %v2020_v56 = vadd.f32 %v2019_v53, %v2716_v29  ;;  %v2093_v57 = vadd.f32 %v2092_v6, %v2716_v29  ;;  %v2126_v1 = vmax.f32 %v2016_v47, 0.0  ;;  %v2128_v2 = vmax.f32 %v2089_v48, 0.0 }
 0x9a1   :  { %v2129_v24 = vmax.f32 %v2018_v51, 0.0  ;;  %v2131_v25 = vmax.f32 %v2091_v52, 0.0 }
 0x9a2   :  { %v2130_v3 = vmax.f32 %v2020_v56, 0.0  ;;  %v2132_v28 = vmax.f32 %v2093_v57, 0.0 }
 0x9a3   :  { %v2157_v4 = vpack.c.bf16 %v2129_v24, %v2125_v58  ;;  %v2159_v27 = vpack.c.bf16 %v2131_v25, %v2127_v61 }
 0x9a4   :  { %v2158_v5 = vpack.c.bf16 %v2130_v3, %v2126_v1  ;;  %v2160_v7 = vpack.c.bf16 %v2132_v28, %v2128_v2  ;;  %v2023_v8 = vpop.f32.mrb[148].mxu0  ;;  %v2096_v9 = vpop.f32.mrb[148].mxu1 }
 0x9a5   :  { %v2024_v10 = vadd.f32 %v2023_v8, %v2726_v54  ;;  %v2097_v11 = vadd.f32 %v2096_v9, %v2726_v54  ;;  %v2025_v12 = vpop.f32.mrb[149].mxu0  ;;  %v2098_v29 = vpop.f32.mrb[149].mxu1 }
 0x9a6   :  { %v2026_v13 = vadd.f32 %v2025_v12, %v2726_v54  ;;  %v2099_v14 = vadd.f32 %v2098_v29, %v2726_v54  ;;  %v2027_v15 = vpop.f32.mrb[150].mxu0  ;;  %v2100_v16 = vpop.f32.mrb[150].mxu1  ;;  %2181 = vmatprep.subr.bf16.mxu0 %v2158_v5  ;;  %2222 = vmatprep.subr.bf16.mxu1 %v2160_v7 }
 0x9a7   :  { %v2028_v17 = vadd.f32 %v2027_v15, %v2728_v55  ;;  %v2101_v18 = vadd.f32 %v2100_v16, %v2728_v55  ;;  %v2029_v19 = vpop.f32.mrb[151].mxu0  ;;  %v2102_v20 = vpop.f32.mrb[151].mxu1  ;;  %2182 = vmatpush1.bf16.msra.mxu0 %v2157_v4  ;;  %2223 = vmatpush1.bf16.msra.mxu1 %v2159_v27  ;;  %v2133_v31 = vmax.f32 %v2024_v10, 0.0  ;;  %v2135_v32 = vmax.f32 %v2097_v11, 0.0 }
 0x9a8   :  { %v2030_v23 = vadd.f32 %v2029_v19, %v2728_v55  ;;  %v2103_v30 = vadd.f32 %v2102_v20, %v2728_v55  ;;  %v2134_v34 = vmax.f32 %v2026_v13, 0.0  ;;  %v2136_v35 = vmax.f32 %v2099_v14, 0.0 }
 0x9a9   :  { %v2137_v33 = vmax.f32 %v2028_v17, 0.0  ;;  %v2139_v54 = vmax.f32 %v2101_v18, 0.0 }
 0x9aa   :  { %v2138_v36 = vmax.f32 %v2030_v23, 0.0  ;;  %v2140_v37 = vmax.f32 %v2103_v30, 0.0 }
 0x9ab   :  { %v2161_v38 = vpack.c.bf16 %v2137_v33, %v2133_v31  ;;  %v2163_v62 = vpack.c.bf16 %v2139_v54, %v2135_v32 }
 0x9ac   :  { %v2162_v26 = vpack.c.bf16 %v2138_v36, %v2134_v34  ;;  %v2164_v39 = vpack.c.bf16 %v2140_v37, %v2136_v35  ;;  %v2033_v63 = vpop.f32.mrb[152].mxu0  ;;  %v2106_v40 = vpop.f32.mrb[152].mxu1 }
 0x9ad   :  { %v2034_v41 = vadd.f32 %v2033_v63, %v2738_v21  ;;  %v2107_v42 = vadd.f32 %v2106_v40, %v2738_v21  ;;  %v2035_v43 = vpop.f32.mrb[153].mxu0  ;;  %v2108_v55 = vpop.f32.mrb[153].mxu1 }
 0x9ae   :  { %v2036_v44 = vadd.f32 %v2035_v43, %v2738_v21  ;;  %v2109_v45 = vadd.f32 %v2108_v55, %v2738_v21  ;;  %v2037_v0 = vpop.f32.mrb[154].mxu0  ;;  %v2110_v46 = vpop.f32.mrb[154].mxu1  ;;  %2183 = vmatprep.subr.bf16.mxu0 %v2162_v26  ;;  %2224 = vmatprep.subr.bf16.mxu1 %v2164_v39 }
 0x9af   :  { %v2038_v47 = vadd.f32 %v2037_v0, %v2740_v22  ;;  %v2111_v48 = vadd.f32 %v2110_v46, %v2740_v22  ;;  %v2039_v49 = vpop.f32.mrb[155].mxu0  ;;  %v2112_v50 = vpop.f32.mrb[155].mxu1  ;;  %2184 = vmatpush1.bf16.msra.mxu0 %v2161_v38  ;;  %2225 = vmatpush1.bf16.msra.mxu1 %v2163_v62  ;;  %v2141_v53 = vmax.f32 %v2034_v41, 0.0  ;;  %v2143_v6 = vmax.f32 %v2107_v42, 0.0 }
 0x9b0   :  { %v2040_v51 = vadd.f32 %v2039_v49, %v2740_v22  ;;  %v2113_v52 = vadd.f32 %v2112_v50, %v2740_v22  ;;  %v2142_v57 = vmax.f32 %v2036_v44, 0.0  ;;  %v2144_v58 = vmax.f32 %v2109_v45, 0.0  ;;  %v2176_v35 = vpop.permute.xlu0 %2175 }
 0x9b1   :  { %v2145_v56 = vmax.f32 %v2038_v47, 0.0  ;;  %v2147_v21 = vmax.f32 %v2111_v48, 0.0 }
 0x9b2   :  { %v2146_v61 = vmax.f32 %v2040_v51, 0.0  ;;  %v2148_v24 = vmax.f32 %v2113_v52, 0.0 }
 0x9b3   :  { %v2165_v25 = vpack.c.bf16 %v2145_v56, %v2141_v53  ;;  %v2167_v1 = vpack.c.bf16 %v2147_v21, %v2143_v6 }
 0x9b4   :  { %v2166_v2 = vpack.c.bf16 %v2146_v61, %v2142_v57  ;;  %v2168_v3 = vpack.c.bf16 %v2148_v24, %v2144_v58  ;;  %v2043_v28 = vpop.f32.mrb[156].mxu0  ;;  %v2116_v4 = vpop.f32.mrb[156].mxu1 }
 0x9b5   :  { %v2044_v27 = vadd.f32 %v2043_v28, %v2750_v59  ;;  %v2117_v5 = vadd.f32 %v2116_v4, %v2750_v59  ;;  %v2045_v7 = vpop.f32.mrb[157].mxu0  ;;  %v2118_v22 = vpop.f32.mrb[157].mxu1 }
 0x9b6   :  { %v2046_v8 = vadd.f32 %v2045_v7, %v2750_v59  ;;  %v2119_v9 = vadd.f32 %v2118_v22, %v2750_v59  ;;  %v2047_v10 = vpop.f32.mrb[158].mxu0  ;;  %v2120_v11 = vpop.f32.mrb[158].mxu1  ;;  %2185 = vmatprep.subr.bf16.mxu0 %v2166_v2  ;;  %2226 = vmatprep.subr.bf16.mxu1 %v2168_v3 }
 0x9b7   :  { %v2048_v12 = vadd.f32 %v2047_v10, %v2752_v60  ;;  %v2121_v29 = vadd.f32 %v2120_v11, %v2752_v60  ;;  %v2049_v13 = vpop.f32.mrb[159].mxu0  ;;  %v2122_v14 = vpop.f32.mrb[159].mxu1  ;;  %2186 = vmatpush1.bf16.msra.mxu0 %v2165_v25  ;;  %2227 = vmatpush1.bf16.msra.mxu1 %v2167_v1  ;;  %v2149_v17 = vmax.f32 %v2044_v27, 0.0  ;;  %v2151_v18 = vmax.f32 %v2117_v5, 0.0 }
 0x9b8   :  { %v2050_v15 = vadd.f32 %v2049_v13, %v2752_v60  ;;  %v2123_v16 = vadd.f32 %v2122_v14, %v2752_v60  ;;  %v2150_v20 = vmax.f32 %v2046_v8, 0.0  ;;  %v2152_v23 = vmax.f32 %v2119_v9, 0.0  ;;  %v44_v60 = vld [vmem:[%s3264_s5] sm:$0x1]  ;;  %s2540_s5 = smov [#allocation2]  }
 0x9b9   :  { %v2153_v19 = vmax.f32 %v2048_v12, 0.0  ;;  %v2155_v59 = vmax.f32 %v2121_v29, 0.0  ;;  %s2369_s18 = sshll.u32 %s2540_s5, 4  ;;  %s2370_s18 = int_to_ptr.vmem [resolvable:$true] %s2369_s18 }
 0x9ba   :  { %v2154_v30 = vmax.f32 %v2050_v15, 0.0  ;;  %v2156_v31 = vmax.f32 %v2123_v16, 0.0  ;;  %s2514_s1 = scalar_lea.vmem %s2370_s18, 128  ;;  %p2519_p1 = scmp.lt.s32.totalorder %s2370_s18, %s2370_s18 }
 0x9bb   :  { %v2169_v32 = vpack.c.bf16 %v2153_v19, %v2149_v17  ;;  %v2171_v33 = vpack.c.bf16 %v2155_v59, %v2151_v18  ;;  %p2515_p0 = scmp.ne.s32.totalorder %s2370_s18, %s2514_s1  ;;  %p2520_p2 = scmp.lt.s32.totalorder %s2514_s1, %s2514_s1 }
 0x9bc   :  { %v2170_v54 = vpack.c.bf16 %v2154_v30, %v2150_v20  ;;  %v2172_v34 = vpack.c.bf16 %v2156_v31, %v2152_v23 }
 0x9bd   :  { %p2521_p3 = por %p2520_p2, %p2519_p1 }
 0x9be   :  { %2187 = vmatprep.subr.bf16.mxu0 %v2170_v54  ;;  %2228 = vmatprep.subr.bf16.mxu1 %v2172_v34 }
 0x9bf   :  { %2188 = vmatpush1.bf16.msra.mxu0 %v2169_v32  ;;  %2229 = vmatpush1.bf16.msra.mxu1 %v2171_v33  ;;  %p2522_p4 = pnand %p2521_p3, %p2515_p0 }
 0x9c2   :  { %2471 = vmatmul.mubr.msk.bf16.vlgmr.msra.gmra.mrb[160].mxu0 %vm414_vm2, %v44_v60  ;;  %2472 = vmatmul.mubr.msk.bf16.vlgmr.msra.gmra.mrb[160].mxu1 %vm414_vm2, %v44_v60 }
 0xa95   :  { %v2215_v36 = vpop.f32.mrb[160].mxu0  ;;  %v2256_v37 = vpop.f32.mrb[160].mxu1 }
 0xa96   :  { %v2216_v38 = vadd.f32 %v2215_v36, %v2176_v35  ;;  %v2257_v62 = vadd.f32 %v2256_v37, %v2176_v35  ;;  %v2217_v26 = vpop.f32.mrb[161].mxu0  ;;  %v2258_v39 = vpop.f32.mrb[161].mxu1 }
 0xa97   :  { %v2218_v63 = vadd.f32 %v2217_v26, %v2176_v35  ;;  %v2259_v40 = vadd.f32 %v2258_v39, %v2176_v35  ;;  %v2219_v41 = vpop.f32.mrb[162].mxu0  ;;  %v2260_v42 = vpop.f32.mrb[162].mxu1 }
 0xa98   :  { %v2264_v43 = vsel %vm2263_vm3, %v2216_v38, -inf  ;;  %v2278_v55 = vsel %vm2263_vm3, %v2257_v62, -inf  ;;  %v2220_v44 = vpop.f32.mrb[163].mxu0  ;;  %v2261_v45 = vpop.f32.mrb[163].mxu1 }
 0xa99   :  { %v2265_v0 = vrot.slane %v2264_v43, 4  ;;  %v2279_v46 = vrot.slane %v2278_v55, 4  ;;  %v2271_v47 = vsel %vm2263_vm3, %v2218_v63, -inf  ;;  %v2285_v48 = vsel %vm2263_vm3, %v2259_v40, -inf }
 0xa9a   :  { %v2272_v49 = vrot.slane %v2271_v47, 4  ;;  %v2286_v50 = vrot.slane %v2285_v48, 4 }
 0xa9b   :  { %v2266_v51 = vmax.f32 %v2264_v43, %v2265_v0  ;;  %v2280_v52 = vmax.f32 %v2278_v55, %v2279_v46 }
 0xa9c   :  { %v2273_v53 = vmax.f32 %v2271_v47, %v2272_v49  ;;  %v2287_v6 = vmax.f32 %v2285_v48, %v2286_v50  ;;  %v2539_v47 = vmov 1983009808   ;;  %v2349_v49 = vlaneseq }
 0xa9d   :  { %v2267_v56 = vrot.slane %v2266_v51, 2  ;;  %v2281_v21 = vrot.slane %v2280_v52, 2  ;;  %v2347_v48 = vunpack.c.l.s4 %v2539_v47 }
 0xa9e   :  { %v2274_v57 = vrot.slane %v2273_v53, 2  ;;  %v2288_v58 = vrot.slane %v2287_v6, 2 }
 0xa9f   :  { %v2268_v61 = vmax.f32 %v2266_v51, %v2267_v56  ;;  %v2282_v24 = vmax.f32 %v2280_v52, %v2281_v21  ;;  %v2348_v50 = vunpack.c.0.s8 %v2347_v48  ;;  %v2350_v51 = vshrl.u32 %v2349_v49, 7 }
 0xaa0   :  { %v2275_v25 = vmax.f32 %v2273_v53, %v2274_v57  ;;  %v2289_v1 = vmax.f32 %v2287_v6, %v2288_v58 }
 0xaa1   :  { %v2269_v2 = vrot.slane %v2268_v61, 1  ;;  %v2283_v3 = vrot.slane %v2282_v24, 1 }
 0xaa2   :  { %v2276_v28 = vrot.slane %v2275_v25, 1  ;;  %v2290_v4 = vrot.slane %v2289_v1, 1 }
 0xaa3   :  { %v2270_v27 = vmax.f32 %v2268_v61, %v2269_v2  ;;  %v2284_v5 = vmax.f32 %v2282_v24, %v2283_v3  ;;  %v2351_v61 = vsub.s32 %v2348_v50, %v2350_v51 }
 0xaa4   :  { %v2277_v7 = vmax.f32 %v2275_v25, %v2276_v28  ;;  %v2291_v22 = vmax.f32 %v2289_v1, %v2290_v4 }
 0xaa5   :  { %v2292_v8 = vsub.f32 %v2216_v38, %v2270_v27  ;;  %v2294_v9 = vsub.f32 %v2257_v62, %v2284_v5 }
 0xaa6   :  { %v2293_v10 = vsub.f32 %v2218_v63, %v2277_v7  ;;  %v2295_v11 = vsub.f32 %v2259_v40, %v2291_v22 }
 0xaa7   :  { %v2296_v12 = vmul.f32 1.442695, %v2292_v8  ;;  %v2300_v29 = vmul.f32 1.442695, %v2294_v9 }
 0xaa8   :  { %v2298_v13 = vmul.f32 1.442695, %v2293_v10  ;;  %v2302_v14 = vmul.f32 1.442695, %v2295_v11 }
 0xaa9   :  { %2490 = vpow2.f32 %v2296_v12 }
 0xaaa   :  { %2492 = vpow2.f32 %v2300_v29 }
 0xaab   :  { %2494 = vpow2.f32 %v2298_v13 }
 0xaac   :  { %2496 = vpow2.f32 %v2302_v14 }
 0xab3   :  { %v2491_v15 = vpop.eup %2490 }
 0xab4   :  { %v2493_v16 = vpop.eup %2492  ;;  %v2304_v17 = vsel %vm2263_vm3, %v2491_v15, 0.0 }
 0xab5   :  { %v2495_v18 = vpop.eup %2494  ;;  %v2305_v19 = vrot.slane %v2304_v17, 4  ;;  %v2318_v59 = vsel %vm2263_vm3, %v2493_v16, 0.0 }
 0xab6   :  { %v2497_v20 = vpop.eup %2496  ;;  %v2319_v23 = vrot.slane %v2318_v59, 4  ;;  %v2311_v30 = vsel %vm2263_vm3, %v2495_v18, 0.0 }
 0xab7   :  { %v2306_v31 = vadd.f32 %v2305_v19, %v2304_v17  ;;  %v2312_v32 = vrot.slane %v2311_v30, 4  ;;  %v2325_v33 = vsel %vm2263_vm3, %v2497_v20, 0.0 }
 0xab8   :  { %v2320_v54 = vadd.f32 %v2319_v23, %v2318_v59  ;;  %v2326_v34 = vrot.slane %v2325_v33, 4 }
 0xab9   :  { %v2307_v60 = vrot.slane %v2306_v31, 2  ;;  %v2313_v35 = vadd.f32 %v2312_v32, %v2311_v30 }
 0xaba   :  { %v2321_v36 = vrot.slane %v2320_v54, 2  ;;  %v2327_v37 = vadd.f32 %v2326_v34, %v2325_v33 }
 0xabb   :  { %v2308_v38 = vadd.f32 %v2307_v60, %v2306_v31  ;;  %v2314_v62 = vrot.slane %v2313_v35, 2 }
 0xabc   :  { %v2322_v26 = vadd.f32 %v2321_v36, %v2320_v54  ;;  %v2328_v39 = vrot.slane %v2327_v37, 2 }
 0xabd   :  { %v2309_v63 = vrot.slane %v2308_v38, 1  ;;  %v2315_v40 = vadd.f32 %v2314_v62, %v2313_v35 }
 0xabe   :  { %v2323_v41 = vrot.slane %v2322_v26, 1  ;;  %v2329_v42 = vadd.f32 %v2328_v39, %v2327_v37 }
 0xabf   :  { %v2310_v43 = vadd.f32 %v2309_v63, %v2308_v38  ;;  %v2316_v55 = vrot.slane %v2315_v40, 1 }
 0xac0   :  { %v2324_v44 = vadd.f32 %v2323_v41, %v2322_v26  ;;  %v2330_v45 = vrot.slane %v2329_v42, 1 }
 0xac1   :  { %v2317_v0 = vadd.f32 %v2316_v55, %v2315_v40  ;;  %2498 = vrcp.f32 %v2310_v43 }
 0xac2   :  { %v2331_v46 = vadd.f32 %v2330_v45, %v2329_v42  ;;  %2500 = vrcp.f32 %v2324_v44 }
 0xac3   :  { %2502 = vrcp.f32 %v2317_v0 }
 0xac4   :  { %2504 = vrcp.f32 %v2331_v46 }
 0xacb   :  { %v2499_v52 = vpop.eup %2498 }
 0xacc   :  { %v2501_v53 = vpop.eup %2500  ;;  %v2336_v6 = vmul.f32 %v2499_v52, %v2491_v15 }
 0xacd   :  { %v2503_v56 = vpop.eup %2502  ;;  %v2338_v21 = vmul.f32 %v2501_v53, %v2493_v16 }
 0xace   :  { %v2505_v57 = vpop.eup %2504  ;;  %v2337_v58 = vmul.f32 %v2503_v56, %v2495_v18 }
 0xacf   :  { %v2339_v24 = vmul.f32 %v2505_v57, %v2497_v20 }
 0xad0   :  { %v2344_v25 = vcombine.low %v2336_v6, %v2337_v58 }
 0xad1   :  { %v2345_v1 = vcombine.low %v2338_v21, %v2339_v24 }
 0xad2   :  { %v2352_v2 = vrot.slane %v2344_v25, %v2351_v61 }
 0xad3   :  { %v2359_v3 = vrot.slane %v2345_v1, %v2351_v61 }
 0xad5   :  { %v2360_v28 = vcombine.low %v2352_v2, %v2359_v3 }
 0xad7   :  { %2362 = vst [vmem:[#allocation2] sm:$0xff] %v2360_v28 }
 0xad8   :  { %2525 = shalt.err (!%p2522_p4)
}
 0xad9   :  { %s2526_s6 = scalar_lea.hbm %s3266_s7, 128 }
 0xada   :  { %p2527_p5 = scmp.ne.s32.totalorder %s3266_s7, %s2526_s6  ;;  %p2530_p6 = scmp.lt.u32.totalorder %s2526_s6, %s3266_s7 }
 0xadc   :  { %p2532_p7 = pnand %p2530_p6, %p2527_p5 }
 0xade   :  { %2535 = shalt.err (!%p2532_p7)
}
 0xadf   :  { %2372 = dma.vmem_to_hbm [thread:$0]  %s2370_s18, 128, %s3266_s7, [#allocation3]  }
 0xae0   :  { %2536 = dma.done.wait [#allocation3], 128  }
 0xae1   :  { %2537 = vsyncadd [#allocation3], 4294967168 }
 0xae2   :  { %2376 = vsyncpa [#allocation3], 1 }

</bundles_post_ra>
